<compile_context>
chip_gen: v5e
topology: v5e:2x2
jax: 0.10.0
libtpu: 0.0.40
codegen_flags: <defaults>
</compile_context>

<pallas_src>
import functools

import jax
import jax.numpy as jnp
from jax.experimental import pallas as pl
from jax.experimental.pallas import tpu as pltpu

# ----------------------------- model config (small) -----------------------------
VOCAB = 100
MAX_POS = 16
TYPE_VOCAB = 2
HIDDEN = 32
HEADS = 4
HEAD_DIM = HIDDEN // HEADS
INTERMEDIATE = 64
LAYERS = 2
NUM_LABELS_TASK1 = 3
NUM_LABELS_TASK2 = 5
LN_EPS = 1e-12


# ----------------------------- fused Pallas kernel -------------------------------
def _ln(x, g, b):
    mu = jnp.mean(x, axis=-1, keepdims=True)
    var = jnp.mean(jnp.square(x - mu), axis=-1, keepdims=True)
    return (x - mu) * jax.lax.rsqrt(var + LN_EPS) * g + b


def _gelu(x):
    # tanh-approx GELU  # TODO(synk): HF BERT default act is erf-based gelu
    return 0.5 * x * (1.0 + jnp.tanh(0.7978845608028654 * (x + 0.044715 * x * x * x)))


def _bert_fused_kernel(
    emb_ref, maskb_ref, sel_ref,
    emb_g_ref, emb_b_ref,
    wqkv_ref, bqkv_ref, wo_ref, bo_ref, ln1_g_ref, ln1_b_ref,
    wi_ref, bi_ref, wo2_ref, bo2_ref, ln2_g_ref, ln2_b_ref,
    pool_w_ref, pool_b_ref, cls1_w_ref, cls1_b_ref, cls2_w_ref, cls2_b_ref,
    logits1_ref, logits2_ref,
):
    """Whole MultiTaskBERT forward on VMEM-resident tiles (no grid)."""
    B, S, _ = maskb_ref.shape
    n_layers = wqkv_ref.shape[0]
    scale = 1.0 / float(HEAD_DIM) ** 0.5

    # --- embedding LayerNorm (residual-free path; no zero tensor DMA) ---
    x = _ln(emb_ref[...], emb_g_ref[...], emb_b_ref[...])            # (B*S, H)
    mask_bias = maskb_ref[...]                                        # (B, S, S)

    for L in range(n_layers):                                         # unrolled (LAYERS=2)
        # --- fused QKV projection: one lane-dense (B*S, 3H) matmul ---
        qkv = jnp.dot(x, wqkv_ref[L], preferred_element_type=jnp.float32) + bqkv_ref[L]

        # --- multi-head self-attention, batched over the batch dim ---
        ctx_heads = []
        for h in range(HEADS):
            lo = h * HEAD_DIM
            q = qkv[:, lo:lo + HEAD_DIM].reshape(B, S, HEAD_DIM)
            k = qkv[:, HIDDEN + lo:HIDDEN + lo + HEAD_DIM].reshape(B, S, HEAD_DIM)
            v = qkv[:, 2 * HIDDEN + lo:2 * HIDDEN + lo + HEAD_DIM].reshape(B, S, HEAD_DIM)
            s = jnp.einsum("bqd,bkd->bqk", q, k,
                           preferred_element_type=jnp.float32) * scale + mask_bias
            s = s - jnp.max(s, axis=-1, keepdims=True)
            p = jnp.exp(s)
            p = p * pl.reciprocal(jnp.sum(p, axis=-1, keepdims=True), approx=True)
            o = jnp.einsum("bqk,bkd->bqd", p, v, preferred_element_type=jnp.float32)
            ctx_heads.append(o.reshape(B * S, HEAD_DIM))
        ctx = jnp.concatenate(ctx_heads, axis=-1)                     # (B*S, H)

        # --- attention output projection + Add&LayerNorm (fused) ---
        attn_out = jnp.dot(ctx, wo_ref[L], preferred_element_type=jnp.float32) + bo_ref[L]
        x = _ln(attn_out + x, ln1_g_ref[L], ln1_b_ref[L])

        # --- FFN (gelu) + Add&LayerNorm (fused) ---
        ffn = jnp.dot(x, wi_ref[L], preferred_element_type=jnp.float32) + bi_ref[L]
        ffn = _gelu(ffn)
        ffn = jnp.dot(ffn, wo2_ref[L], preferred_element_type=jnp.float32) + bo2_ref[L]
        x = _ln(ffn + x, ln2_g_ref[L], ln2_b_ref[L])

    # --- pooler: tanh(W_p * h_[CLS] + b_p); CLS rows picked via one-hot matmul ---
    cls = jnp.dot(sel_ref[...], x, preferred_element_type=jnp.float32)        # (B, H)
    pooled = jnp.tanh(
        jnp.dot(cls, pool_w_ref[...], preferred_element_type=jnp.float32) + pool_b_ref[...])

    # nn.Dropout(0.1): identity at inference time.
    # Both task heads computed from the shared pooled output (encoder runs once).
    logits1_ref[...] = jnp.dot(pooled, cls1_w_ref[...],
                               preferred_element_type=jnp.float32) + cls1_b_ref[...]
    logits2_ref[...] = jnp.dot(pooled, cls2_w_ref[...],
                               preferred_element_type=jnp.float32) + cls2_b_ref[...]


# ----------------------------- parameter init (PyTorch layout) -------------------
def init_params(key):
    keys = iter(jax.random.split(key, 128))

    def nrm(shape):
        return jax.random.normal(next(keys), shape, jnp.float32) * 0.02

    ones = lambda n: jnp.ones((n,), jnp.float32)
    zeros = lambda n: jnp.zeros((n,), jnp.float32)

    p = {
        "word_emb": nrm((VOCAB, HIDDEN)),
        "pos_emb": nrm((MAX_POS, HIDDEN)),
        "type_emb": nrm((TYPE_VOCAB, HIDDEN)),
        "emb_ln_g": ones(HIDDEN),
        "emb_ln_b": zeros(HIDDEN),
        "layers": [],
        "pool_w": nrm((HIDDEN, HIDDEN)),
        "pool_b": zeros(HIDDEN),
        "cls1_w": nrm((NUM_LABELS_TASK1, HIDDEN)),
        "cls1_b": zeros(NUM_LABELS_TASK1),
        "cls2_w": nrm((NUM_LABELS_TASK2, HIDDEN)),
        "cls2_b": zeros(NUM_LABELS_TASK2),
    }
    for _ in range(LAYERS):
        p["layers"].append(dict(
            wq=nrm((HIDDEN, HIDDEN)), bq=zeros(HIDDEN),
            wk=nrm((HIDDEN, HIDDEN)), bk=zeros(HIDDEN),
            wv=nrm((HIDDEN, HIDDEN)), bv=zeros(HIDDEN),
            wo=nrm((HIDDEN, HIDDEN)), bo=zeros(HIDDEN),
            ln1_g=ones(HIDDEN), ln1_b=zeros(HIDDEN),
            wi=nrm((INTERMEDIATE, HIDDEN)), bi=zeros(INTERMEDIATE),
            wo2=nrm((HIDDEN, INTERMEDIATE)), bo2=zeros(HIDDEN),
            ln2_g=ones(HIDDEN), ln2_b=zeros(HIDDEN),
        ))
    return p


def pack_params(p):
    """Pre-transpose nn.Linear weights to [in,out], fuse QKV, stack layers."""
    L = p["layers"]
    stk = lambda f: jnp.stack([f(l) for l in L])
    return {
        "word_emb": p["word_emb"],
        "pos_emb": p["pos_emb"],
        "type_emb": p["type_emb"],
        "emb_ln_g": p["emb_ln_g"].reshape(1, HIDDEN),
        "emb_ln_b": p["emb_ln_b"].reshape(1, HIDDEN),
        "wqkv": stk(lambda l: jnp.concatenate([l["wq"].T, l["wk"].T, l["wv"].T], axis=1)),
        "bqkv": stk(lambda l: jnp.concatenate([l["bq"], l["bk"], l["bv"]]).reshape(1, 3 * HIDDEN)),
        "wo": stk(lambda l: l["wo"].T),
        "bo": stk(lambda l: l["bo"].reshape(1, HIDDEN)),
        "ln1_g": stk(lambda l: l["ln1_g"].reshape(1, HIDDEN)),
        "ln1_b": stk(lambda l: l["ln1_b"].reshape(1, HIDDEN)),
        "wi": stk(lambda l: l["wi"].T),
        "bi": stk(lambda l: l["bi"].reshape(1, INTERMEDIATE)),
        "wo2": stk(lambda l: l["wo2"].T),
        "bo2": stk(lambda l: l["bo2"].reshape(1, HIDDEN)),
        "ln2_g": stk(lambda l: l["ln2_g"].reshape(1, HIDDEN)),
        "ln2_b": stk(lambda l: l["ln2_b"].reshape(1, HIDDEN)),
        "pool_w": p["pool_w"].T,
        "pool_b": p["pool_b"].reshape(1, HIDDEN),
        "cls1_w": p["cls1_w"].T,
        "cls1_b": p["cls1_b"].reshape(1, NUM_LABELS_TASK1),
        "cls2_w": p["cls2_w"].T,
        "cls2_b": p["cls2_b"].reshape(1, NUM_LABELS_TASK2),
    }


# ----------------------------- forward pass --------------------------------------
def multitask_bert_forward_shared(packed, input_ids, attention_mask):
    """One fused pallas_call; returns (logits_task1, logits_task2)."""
    B, S = input_ids.shape

    # Embedding lookups stay as XLA glue (gather); everything else is in-kernel.
    emb = (packed["word_emb"][input_ids]
           + packed["pos_emb"][:S][None, :, :]
           + packed["type_emb"][0][None, None, :]).astype(jnp.float32)
    emb = emb.reshape(B * S, HIDDEN)

    # BERT-style extended attention mask -> additive bias, pre-broadcast to (B,S,S).
    bias = (1.0 - attention_mask.astype(jnp.float32)) * -10000.0
    maskb = jnp.broadcast_to(bias[:, None, :], (B, S, S))

    # One-hot selector that picks the [CLS] row of every sequence via a matmul.
    sel = (jnp.arange(B * S)[None, :] == (jnp.arange(B) * S)[:, None]).astype(jnp.float32)

    out_shape = (jax.ShapeDtypeStruct((B, NUM_LABELS_TASK1), jnp.float32),
                 jax.ShapeDtypeStruct((B, NUM_LABELS_TASK2), jnp.float32))
    return pl.pallas_call(_bert_fused_kernel, out_shape=out_shape)(
        emb, maskb, sel,
        packed["emb_ln_g"], packed["emb_ln_b"],
        packed["wqkv"], packed["bqkv"], packed["wo"], packed["bo"],
        packed["ln1_g"], packed["ln1_b"],
        packed["wi"], packed["bi"], packed["wo2"], packed["bo2"],
        packed["ln2_g"], packed["ln2_b"],
        packed["pool_w"], packed["pool_b"],
        packed["cls1_w"], packed["cls1_b"], packed["cls2_w"], packed["cls2_b"],
    )


def multitask_bert_forward(packed, input_ids, attention_mask, task):
    """API parity with MultiTaskBERT.forward(input_ids, attention_mask, task)."""
    logits1, logits2 = multitask_bert_forward_shared(packed, input_ids, attention_mask)
    if task == 1:
        return logits1
    elif task == 2:
        return logits2
    raise ValueError("Invalid task identifier.")


# ----------------------------- pure-JAX reference (for validation) ----------------
def reference_forward(p, input_ids, attention_mask):
    B, S = input_ids.shape

    def ln(x, g, b):
        mu = jnp.mean(x, -1, keepdims=True)
        var = jnp.mean(jnp.square(x - mu), -1, keepdims=True)
        return (x - mu) / jnp.sqrt(var + LN_EPS) * g + b

    def gelu(x):
        return 0.5 * x * (1.0 + jnp.tanh(0.7978845608028654 * (x + 0.044715 * x ** 3)))

    emb = (p["word_emb"][input_ids] + p["pos_emb"][:S][None]
           + p["type_emb"][0][None, None]).astype(jnp.float32)
    x = ln(emb, p["emb_ln_g"], p["emb_ln_b"])                      # (B, S, H)
    bias = ((1.0 - attention_mask.astype(jnp.float32)) * -10000.0)[:, None, None, :]

    for L in p["layers"]:
        def split(t):
            return t.reshape(B, S, HEADS, HEAD_DIM).transpose(0, 2, 1, 3)
        q = split(x @ L["wq"].T + L["bq"])
        k = split(x @ L["wk"].T + L["bk"])
        v = split(x @ L["wv"].T + L["bv"])
        s = jnp.einsum("bhqd,bhkd->bhqk", q, k) / (HEAD_DIM ** 0.5) + bias
        a = jax.nn.softmax(s, axis=-1)
        ctx = jnp.einsum("bhqk,bhkd->bhqd", a, v).transpose(0, 2, 1, 3).reshape(B, S, HIDDEN)
        x = ln(ctx @ L["wo"].T + L["bo"] + x, L["ln1_g"], L["ln1_b"])
        f = gelu(x @ L["wi"].T + L["bi"])
        x = ln(f @ L["wo2"].T + L["bo2"] + x, L["ln2_g"], L["ln2_b"])

    pooled = jnp.tanh(x[:, 0] @ p["pool_w"].T + p["pool_b"])
    return pooled @ p["cls1_w"].T + p["cls1_b"], pooled @ p["cls2_w"].T + p["cls2_b"]


# ----------------------------- main ------------------------------------------------
if __name__ == "__main__":
    key = jax.random.PRNGKey(0)
    pkey, ikey = jax.random.split(key)
    params = init_params(pkey)
    packed = pack_params(params)

    B, S = 2, 8
    input_ids = jax.random.randint(ikey, (B, S), 0, VOCAB, dtype=jnp.int32)
    # simple attention mask: last two tokens of second sequence are padding
    attention_mask = jnp.array(
        [[1, 1, 1, 1, 1, 1, 1, 1],
         [1, 1, 1, 1, 1, 1, 0, 0]], dtype=jnp.int32)

    # Encoder runs ONCE; both task heads come from the same fused kernel call.
    fwd = jax.jit(multitask_bert_forward_shared)
    logits_t1, logits_t2 = fwd(packed, input_ids, attention_mask)
    jax.block_until_ready((logits_t1, logits_t2))

    assert logits_t1.shape == (B, NUM_LABELS_TASK1)
    assert logits_t2.shape == (B, NUM_LABELS_TASK2)

    # correctness check vs. pure-JAX reference (approx reciprocal in softmax
    # introduces only tiny deviations)
    ref1, ref2 = reference_forward(params, input_ids, attention_mask)
    assert jnp.allclose(logits_t1, ref1, atol=2e-3, rtol=2e-3)
    assert jnp.allclose(logits_t2, ref2, atol=2e-3, rtol=2e-3)

    print("KERNEL_OK")
</pallas_src>

<mosaic_0001>
module attributes {stable_mosaic.version = 11 : i64} {
  func.func @_bert_fused_kernel(%arg0: memref<16x32xf32, #tpu.memory_space<vmem>>, %arg1: memref<2x8x8xf32, #tpu.memory_space<vmem>>, %arg2: memref<2x16xf32, #tpu.memory_space<vmem>>, %arg3: memref<1x32xf32, #tpu.memory_space<vmem>>, %arg4: memref<1x32xf32, #tpu.memory_space<vmem>>, %arg5: memref<2x32x96xf32, #tpu.memory_space<vmem>>, %arg6: memref<2x1x96xf32, #tpu.memory_space<vmem>>, %arg7: memref<2x32x32xf32, #tpu.memory_space<vmem>>, %arg8: memref<2x1x32xf32, #tpu.memory_space<vmem>>, %arg9: memref<2x1x32xf32, #tpu.memory_space<vmem>>, %arg10: memref<2x1x32xf32, #tpu.memory_space<vmem>>, %arg11: memref<2x32x64xf32, #tpu.memory_space<vmem>>, %arg12: memref<2x1x64xf32, #tpu.memory_space<vmem>>, %arg13: memref<2x64x32xf32, #tpu.memory_space<vmem>>, %arg14: memref<2x1x32xf32, #tpu.memory_space<vmem>>, %arg15: memref<2x1x32xf32, #tpu.memory_space<vmem>>, %arg16: memref<2x1x32xf32, #tpu.memory_space<vmem>>, %arg17: memref<32x32xf32, #tpu.memory_space<vmem>>, %arg18: memref<1x32xf32, #tpu.memory_space<vmem>>, %arg19: memref<32x3xf32, #tpu.memory_space<vmem>>, %arg20: memref<1x3xf32, #tpu.memory_space<vmem>>, %arg21: memref<32x5xf32, #tpu.memory_space<vmem>>, %arg22: memref<1x5xf32, #tpu.memory_space<vmem>>, %arg23: memref<2x3xf32, #tpu.memory_space<vmem>>, %arg24: memref<2x5xf32, #tpu.memory_space<vmem>>) attributes {dimension_semantics = [], scalar_prefetch = 0 : i64, scratch_operands = 0 : i64, tpu.core_type = #tpu.core_type<tc>} {
    %c0 = arith.constant 0 : index
    %c0_0 = arith.constant 0 : index
    %0 = vector.load %arg0[%c0, %c0_0] : memref<16x32xf32, #tpu.memory_space<vmem>>, vector<16x32xf32>
    %c0_1 = arith.constant 0 : index
    %c0_2 = arith.constant 0 : index
    %1 = vector.load %arg3[%c0_1, %c0_2] : memref<1x32xf32, #tpu.memory_space<vmem>>, vector<1x32xf32>
    %c0_3 = arith.constant 0 : index
    %c0_4 = arith.constant 0 : index
    %2 = vector.load %arg4[%c0_3, %c0_4] : memref<1x32xf32, #tpu.memory_space<vmem>>, vector<1x32xf32>
    %cst = arith.constant dense<0.000000e+00> : vector<16xf32>
    %3 = vector.multi_reduction <add>, %0, %cst [1] : vector<16x32xf32> to vector<16xf32>
    %4 = vector.shape_cast %3 : vector<16xf32> to vector<16x1xf32>
    %cst_5 = arith.constant 3.200000e+01 : f32
    %5 = vector.broadcast %cst_5 : f32 to vector<16x1xf32>
    %6 = arith.divf %4, %5 : vector<16x1xf32>
    %7 = vector.broadcast %6 : vector<16x1xf32> to vector<16x32xf32>
    %8 = arith.subf %0, %7 : vector<16x32xf32>
    %9 = arith.mulf %8, %8 : vector<16x32xf32>
    %cst_6 = arith.constant dense<0.000000e+00> : vector<16xf32>
    %10 = vector.multi_reduction <add>, %9, %cst_6 [1] : vector<16x32xf32> to vector<16xf32>
    %11 = vector.shape_cast %10 : vector<16xf32> to vector<16x1xf32>
    %cst_7 = arith.constant 3.200000e+01 : f32
    %12 = vector.broadcast %cst_7 : f32 to vector<16x1xf32>
    %13 = arith.divf %11, %12 : vector<16x1xf32>
    %14 = vector.broadcast %6 : vector<16x1xf32> to vector<16x32xf32>
    %15 = arith.subf %0, %14 : vector<16x32xf32>
    %cst_8 = arith.constant 9.99999996E-13 : f32
    %16 = vector.broadcast %cst_8 : f32 to vector<16x1xf32>
    %17 = arith.addf %13, %16 : vector<16x1xf32>
    %18 = math.rsqrt %17 : vector<16x1xf32>
    %19 = vector.broadcast %18 : vector<16x1xf32> to vector<16x32xf32>
    %20 = arith.mulf %15, %19 : vector<16x32xf32>
    %21 = vector.broadcast %1 : vector<1x32xf32> to vector<16x32xf32>
    %22 = arith.mulf %20, %21 : vector<16x32xf32>
    %23 = vector.broadcast %2 : vector<1x32xf32> to vector<16x32xf32>
    %24 = arith.addf %22, %23 : vector<16x32xf32>
    %c0_9 = arith.constant 0 : index
    %c0_10 = arith.constant 0 : index
    %c0_11 = arith.constant 0 : index
    %25 = vector.load %arg1[%c0_9, %c0_10, %c0_11] : memref<2x8x8xf32, #tpu.memory_space<vmem>>, vector<2x8x8xf32>
    %c0_12 = arith.constant 0 : index
    %c0_13 = arith.constant 0 : index
    %c0_14 = arith.constant 0 : index
    %26 = vector.load %arg5[%c0_12, %c0_13, %c0_14] : memref<2x32x96xf32, #tpu.memory_space<vmem>>, vector<1x32x96xf32>
    %27 = vector.shape_cast %26 : vector<1x32x96xf32> to vector<32x96xf32>
    %cst_15 = arith.constant dense<0.000000e+00> : vector<16x96xf32>
    %28 = tpu.matmul %24, %27, %cst_15 {dimension_numbers = #tpu.dot_dimension_numbers<[1], [0], [0], [1], [0, 0, 1, 1], [], []>} : vector<16x32xf32>, vector<32x96xf32>, vector<16x96xf32> -> vector<16x96xf32>
    %c0_16 = arith.constant 0 : index
    %c0_17 = arith.constant 0 : index
    %c0_18 = arith.constant 0 : index
    %29 = vector.load %arg6[%c0_16, %c0_17, %c0_18] : memref<2x1x96xf32, #tpu.memory_space<vmem>>, vector<1x1x96xf32>
    %30 = vector.shape_cast %29 : vector<1x1x96xf32> to vector<1x96xf32>
    %31 = vector.broadcast %30 : vector<1x96xf32> to vector<16x96xf32>
    %32 = arith.addf %28, %31 : vector<16x96xf32>
    %33 = vector.extract_strided_slice %32 {offsets = [0, 0], sizes = [16, 8], strides = [1, 1]} : vector<16x96xf32> to vector<16x8xf32>
    %34 = vector.shape_cast %33 : vector<16x8xf32> to vector<2x8x8xf32>
    %35 = vector.extract_strided_slice %32 {offsets = [0, 32], sizes = [16, 8], strides = [1, 1]} : vector<16x96xf32> to vector<16x8xf32>
    %36 = vector.shape_cast %35 : vector<16x8xf32> to vector<2x8x8xf32>
    %37 = vector.extract_strided_slice %32 {offsets = [0, 64], sizes = [16, 8], strides = [1, 1]} : vector<16x96xf32> to vector<16x8xf32>
    %38 = vector.shape_cast %37 : vector<16x8xf32> to vector<2x8x8xf32>
    "tpu.trace_start"() <{level = 10 : i32, message = "bqd,bkd->bqk"}> : () -> ()
    %cst_19 = arith.constant dense<0.000000e+00> : vector<2x8x8xf32>
    %39 = tpu.matmul %34, %36, %cst_19 {dimension_numbers = #tpu.dot_dimension_numbers<[2], [2], [1], [1], [0, 0, 0, 1, 1, 1], [0], [0]>} : vector<2x8x8xf32>, vector<2x8x8xf32>, vector<2x8x8xf32> -> vector<2x8x8xf32>
    "tpu.trace_stop"() : () -> ()
    %cst_20 = arith.constant 0.353553385 : f32
    %40 = vector.broadcast %cst_20 : f32 to vector<2x8x8xf32>
    %41 = arith.mulf %39, %40 : vector<2x8x8xf32>
    %42 = arith.addf %41, %25 : vector<2x8x8xf32>
    %cst_21 = arith.constant dense<0xFF800000> : vector<2x8xf32>
    %43 = vector.multi_reduction <maximumf>, %42, %cst_21 [2] : vector<2x8x8xf32> to vector<2x8xf32>
    %44 = vector.shape_cast %43 : vector<2x8xf32> to vector<2x8x1xf32>
    %45 = vector.broadcast %44 : vector<2x8x1xf32> to vector<2x8x8xf32>
    %46 = arith.subf %42, %45 : vector<2x8x8xf32>
    %47 = math.exp %46 : vector<2x8x8xf32>
    %cst_22 = arith.constant dense<0.000000e+00> : vector<2x8xf32>
    %48 = vector.multi_reduction <add>, %47, %cst_22 [2] : vector<2x8x8xf32> to vector<2x8xf32>
    %49 = vector.shape_cast %48 : vector<2x8xf32> to vector<2x8x1xf32>
    %50 = tpu.reciprocal %49 {approx = true} : vector<2x8x1xf32> -> vector<2x8x1xf32>
    %51 = vector.broadcast %50 : vector<2x8x1xf32> to vector<2x8x8xf32>
    %52 = arith.mulf %47, %51 : vector<2x8x8xf32>
    "tpu.trace_start"() <{level = 10 : i32, message = "bqk,bkd->bqd"}> : () -> ()
    %cst_23 = arith.constant dense<0.000000e+00> : vector<2x8x8xf32>
    %53 = tpu.matmul %52, %38, %cst_23 {dimension_numbers = #tpu.dot_dimension_numbers<[2], [1], [1], [2], [0, 0, 0, 1, 1, 2], [0], [0]>} : vector<2x8x8xf32>, vector<2x8x8xf32>, vector<2x8x8xf32> -> vector<2x8x8xf32>
    "tpu.trace_stop"() : () -> ()
    %54 = vector.shape_cast %53 : vector<2x8x8xf32> to vector<16x8xf32>
    %55 = vector.extract_strided_slice %32 {offsets = [0, 8], sizes = [16, 8], strides = [1, 1]} : vector<16x96xf32> to vector<16x8xf32>
    %56 = vector.shape_cast %55 : vector<16x8xf32> to vector<2x8x8xf32>
    %57 = vector.extract_strided_slice %32 {offsets = [0, 40], sizes = [16, 8], strides = [1, 1]} : vector<16x96xf32> to vector<16x8xf32>
    %58 = vector.shape_cast %57 : vector<16x8xf32> to vector<2x8x8xf32>
    %59 = vector.extract_strided_slice %32 {offsets = [0, 72], sizes = [16, 8], strides = [1, 1]} : vector<16x96xf32> to vector<16x8xf32>
    %60 = vector.shape_cast %59 : vector<16x8xf32> to vector<2x8x8xf32>
    "tpu.trace_start"() <{level = 10 : i32, message = "bqd,bkd->bqk"}> : () -> ()
    %cst_24 = arith.constant dense<0.000000e+00> : vector<2x8x8xf32>
    %61 = tpu.matmul %56, %58, %cst_24 {dimension_numbers = #tpu.dot_dimension_numbers<[2], [2], [1], [1], [0, 0, 0, 1, 1, 1], [0], [0]>} : vector<2x8x8xf32>, vector<2x8x8xf32>, vector<2x8x8xf32> -> vector<2x8x8xf32>
    "tpu.trace_stop"() : () -> ()
    %cst_25 = arith.constant 0.353553385 : f32
    %62 = vector.broadcast %cst_25 : f32 to vector<2x8x8xf32>
    %63 = arith.mulf %61, %62 : vector<2x8x8xf32>
    %64 = arith.addf %63, %25 : vector<2x8x8xf32>
    %cst_26 = arith.constant dense<0xFF800000> : vector<2x8xf32>
    %65 = vector.multi_reduction <maximumf>, %64, %cst_26 [2] : vector<2x8x8xf32> to vector<2x8xf32>
    %66 = vector.shape_cast %65 : vector<2x8xf32> to vector<2x8x1xf32>
    %67 = vector.broadcast %66 : vector<2x8x1xf32> to vector<2x8x8xf32>
    %68 = arith.subf %64, %67 : vector<2x8x8xf32>
    %69 = math.exp %68 : vector<2x8x8xf32>
    %cst_27 = arith.constant dense<0.000000e+00> : vector<2x8xf32>
    %70 = vector.multi_reduction <add>, %69, %cst_27 [2] : vector<2x8x8xf32> to vector<2x8xf32>
    %71 = vector.shape_cast %70 : vector<2x8xf32> to vector<2x8x1xf32>
    %72 = tpu.reciprocal %71 {approx = true} : vector<2x8x1xf32> -> vector<2x8x1xf32>
    %73 = vector.broadcast %72 : vector<2x8x1xf32> to vector<2x8x8xf32>
    %74 = arith.mulf %69, %73 : vector<2x8x8xf32>
    "tpu.trace_start"() <{level = 10 : i32, message = "bqk,bkd->bqd"}> : () -> ()
    %cst_28 = arith.constant dense<0.000000e+00> : vector<2x8x8xf32>
    %75 = tpu.matmul %74, %60, %cst_28 {dimension_numbers = #tpu.dot_dimension_numbers<[2], [1], [1], [2], [0, 0, 0, 1, 1, 2], [0], [0]>} : vector<2x8x8xf32>, vector<2x8x8xf32>, vector<2x8x8xf32> -> vector<2x8x8xf32>
    "tpu.trace_stop"() : () -> ()
    %76 = vector.shape_cast %75 : vector<2x8x8xf32> to vector<16x8xf32>
    %77 = vector.extract_strided_slice %32 {offsets = [0, 16], sizes = [16, 8], strides = [1, 1]} : vector<16x96xf32> to vector<16x8xf32>
    %78 = vector.shape_cast %77 : vector<16x8xf32> to vector<2x8x8xf32>
    %79 = vector.extract_strided_slice %32 {offsets = [0, 48], sizes = [16, 8], strides = [1, 1]} : vector<16x96xf32> to vector<16x8xf32>
    %80 = vector.shape_cast %79 : vector<16x8xf32> to vector<2x8x8xf32>
    %81 = vector.extract_strided_slice %32 {offsets = [0, 80], sizes = [16, 8], strides = [1, 1]} : vector<16x96xf32> to vector<16x8xf32>
    %82 = vector.shape_cast %81 : vector<16x8xf32> to vector<2x8x8xf32>
    "tpu.trace_start"() <{level = 10 : i32, message = "bqd,bkd->bqk"}> : () -> ()
    %cst_29 = arith.constant dense<0.000000e+00> : vector<2x8x8xf32>
    %83 = tpu.matmul %78, %80, %cst_29 {dimension_numbers = #tpu.dot_dimension_numbers<[2], [2], [1], [1], [0, 0, 0, 1, 1, 1], [0], [0]>} : vector<2x8x8xf32>, vector<2x8x8xf32>, vector<2x8x8xf32> -> vector<2x8x8xf32>
    "tpu.trace_stop"() : () -> ()
    %cst_30 = arith.constant 0.353553385 : f32
    %84 = vector.broadcast %cst_30 : f32 to vector<2x8x8xf32>
    %85 = arith.mulf %83, %84 : vector<2x8x8xf32>
    %86 = arith.addf %85, %25 : vector<2x8x8xf32>
    %cst_31 = arith.constant dense<0xFF800000> : vector<2x8xf32>
    %87 = vector.multi_reduction <maximumf>, %86, %cst_31 [2] : vector<2x8x8xf32> to vector<2x8xf32>
    %88 = vector.shape_cast %87 : vector<2x8xf32> to vector<2x8x1xf32>
    %89 = vector.broadcast %88 : vector<2x8x1xf32> to vector<2x8x8xf32>
    %90 = arith.subf %86, %89 : vector<2x8x8xf32>
    %91 = math.exp %90 : vector<2x8x8xf32>
    %cst_32 = arith.constant dense<0.000000e+00> : vector<2x8xf32>
    %92 = vector.multi_reduction <add>, %91, %cst_32 [2] : vector<2x8x8xf32> to vector<2x8xf32>
    %93 = vector.shape_cast %92 : vector<2x8xf32> to vector<2x8x1xf32>
    %94 = tpu.reciprocal %93 {approx = true} : vector<2x8x1xf32> -> vector<2x8x1xf32>
    %95 = vector.broadcast %94 : vector<2x8x1xf32> to vector<2x8x8xf32>
    %96 = arith.mulf %91, %95 : vector<2x8x8xf32>
    "tpu.trace_start"() <{level = 10 : i32, message = "bqk,bkd->bqd"}> : () -> ()
    %cst_33 = arith.constant dense<0.000000e+00> : vector<2x8x8xf32>
    %97 = tpu.matmul %96, %82, %cst_33 {dimension_numbers = #tpu.dot_dimension_numbers<[2], [1], [1], [2], [0, 0, 0, 1, 1, 2], [0], [0]>} : vector<2x8x8xf32>, vector<2x8x8xf32>, vector<2x8x8xf32> -> vector<2x8x8xf32>
    "tpu.trace_stop"() : () -> ()
    %98 = vector.shape_cast %97 : vector<2x8x8xf32> to vector<16x8xf32>
    %99 = vector.extract_strided_slice %32 {offsets = [0, 24], sizes = [16, 8], strides = [1, 1]} : vector<16x96xf32> to vector<16x8xf32>
    %100 = vector.shape_cast %99 : vector<16x8xf32> to vector<2x8x8xf32>
    %101 = vector.extract_strided_slice %32 {offsets = [0, 56], sizes = [16, 8], strides = [1, 1]} : vector<16x96xf32> to vector<16x8xf32>
    %102 = vector.shape_cast %101 : vector<16x8xf32> to vector<2x8x8xf32>
    %103 = vector.extract_strided_slice %32 {offsets = [0, 88], sizes = [16, 8], strides = [1, 1]} : vector<16x96xf32> to vector<16x8xf32>
    %104 = vector.shape_cast %103 : vector<16x8xf32> to vector<2x8x8xf32>
    "tpu.trace_start"() <{level = 10 : i32, message = "bqd,bkd->bqk"}> : () -> ()
    %cst_34 = arith.constant dense<0.000000e+00> : vector<2x8x8xf32>
    %105 = tpu.matmul %100, %102, %cst_34 {dimension_numbers = #tpu.dot_dimension_numbers<[2], [2], [1], [1], [0, 0, 0, 1, 1, 1], [0], [0]>} : vector<2x8x8xf32>, vector<2x8x8xf32>, vector<2x8x8xf32> -> vector<2x8x8xf32>
    "tpu.trace_stop"() : () -> ()
    %cst_35 = arith.constant 0.353553385 : f32
    %106 = vector.broadcast %cst_35 : f32 to vector<2x8x8xf32>
    %107 = arith.mulf %105, %106 : vector<2x8x8xf32>
    %108 = arith.addf %107, %25 : vector<2x8x8xf32>
    %cst_36 = arith.constant dense<0xFF800000> : vector<2x8xf32>
    %109 = vector.multi_reduction <maximumf>, %108, %cst_36 [2] : vector<2x8x8xf32> to vector<2x8xf32>
    %110 = vector.shape_cast %109 : vector<2x8xf32> to vector<2x8x1xf32>
    %111 = vector.broadcast %110 : vector<2x8x1xf32> to vector<2x8x8xf32>
    %112 = arith.subf %108, %111 : vector<2x8x8xf32>
    %113 = math.exp %112 : vector<2x8x8xf32>
    %cst_37 = arith.constant dense<0.000000e+00> : vector<2x8xf32>
    %114 = vector.multi_reduction <add>, %113, %cst_37 [2] : vector<2x8x8xf32> to vector<2x8xf32>
    %115 = vector.shape_cast %114 : vector<2x8xf32> to vector<2x8x1xf32>
    %116 = tpu.reciprocal %115 {approx = true} : vector<2x8x1xf32> -> vector<2x8x1xf32>
    %117 = vector.broadcast %116 : vector<2x8x1xf32> to vector<2x8x8xf32>
    %118 = arith.mulf %113, %117 : vector<2x8x8xf32>
    "tpu.trace_start"() <{level = 10 : i32, message = "bqk,bkd->bqd"}> : () -> ()
    %cst_38 = arith.constant dense<0.000000e+00> : vector<2x8x8xf32>
    %119 = tpu.matmul %118, %104, %cst_38 {dimension_numbers = #tpu.dot_dimension_numbers<[2], [1], [1], [2], [0, 0, 0, 1, 1, 2], [0], [0]>} : vector<2x8x8xf32>, vector<2x8x8xf32>, vector<2x8x8xf32> -> vector<2x8x8xf32>
    "tpu.trace_stop"() : () -> ()
    %120 = vector.shape_cast %119 : vector<2x8x8xf32> to vector<16x8xf32>
    %121 = tpu.concatenate %54, %76, %98, %120 in 1 : vector<16x8xf32>, vector<16x8xf32>, vector<16x8xf32>, vector<16x8xf32> -> vector<16x32xf32>
    %c0_39 = arith.constant 0 : index
    %c0_40 = arith.constant 0 : index
    %c0_41 = arith.constant 0 : index
    %122 = vector.load %arg7[%c0_39, %c0_40, %c0_41] : memref<2x32x32xf32, #tpu.memory_space<vmem>>, vector<1x32x32xf32>
    %123 = vector.shape_cast %122 : vector<1x32x32xf32> to vector<32x32xf32>
    %cst_42 = arith.constant dense<0.000000e+00> : vector<16x32xf32>
    %124 = tpu.matmul %121, %123, %cst_42 {dimension_numbers = #tpu.dot_dimension_numbers<[1], [0], [0], [1], [0, 0, 1, 1], [], []>} : vector<16x32xf32>, vector<32x32xf32>, vector<16x32xf32> -> vector<16x32xf32>
    %c0_43 = arith.constant 0 : index
    %c0_44 = arith.constant 0 : index
    %c0_45 = arith.constant 0 : index
    %125 = vector.load %arg8[%c0_43, %c0_44, %c0_45] : memref<2x1x32xf32, #tpu.memory_space<vmem>>, vector<1x1x32xf32>
    %126 = vector.shape_cast %125 : vector<1x1x32xf32> to vector<1x32xf32>
    %127 = vector.broadcast %126 : vector<1x32xf32> to vector<16x32xf32>
    %128 = arith.addf %124, %127 : vector<16x32xf32>
    %129 = arith.addf %128, %24 : vector<16x32xf32>
    %c0_46 = arith.constant 0 : index
    %c0_47 = arith.constant 0 : index
    %c0_48 = arith.constant 0 : index
    %130 = vector.load %arg9[%c0_46, %c0_47, %c0_48] : memref<2x1x32xf32, #tpu.memory_space<vmem>>, vector<1x1x32xf32>
    %131 = vector.shape_cast %130 : vector<1x1x32xf32> to vector<1x32xf32>
    %c0_49 = arith.constant 0 : index
    %c0_50 = arith.constant 0 : index
    %c0_51 = arith.constant 0 : index
    %132 = vector.load %arg10[%c0_49, %c0_50, %c0_51] : memref<2x1x32xf32, #tpu.memory_space<vmem>>, vector<1x1x32xf32>
    %133 = vector.shape_cast %132 : vector<1x1x32xf32> to vector<1x32xf32>
    %cst_52 = arith.constant dense<0.000000e+00> : vector<16xf32>
    %134 = vector.multi_reduction <add>, %129, %cst_52 [1] : vector<16x32xf32> to vector<16xf32>
    %135 = vector.shape_cast %134 : vector<16xf32> to vector<16x1xf32>
    %cst_53 = arith.constant 3.200000e+01 : f32
    %136 = vector.broadcast %cst_53 : f32 to vector<16x1xf32>
    %137 = arith.divf %135, %136 : vector<16x1xf32>
    %138 = vector.broadcast %137 : vector<16x1xf32> to vector<16x32xf32>
    %139 = arith.subf %129, %138 : vector<16x32xf32>
    %140 = arith.mulf %139, %139 : vector<16x32xf32>
    %cst_54 = arith.constant dense<0.000000e+00> : vector<16xf32>
    %141 = vector.multi_reduction <add>, %140, %cst_54 [1] : vector<16x32xf32> to vector<16xf32>
    %142 = vector.shape_cast %141 : vector<16xf32> to vector<16x1xf32>
    %cst_55 = arith.constant 3.200000e+01 : f32
    %143 = vector.broadcast %cst_55 : f32 to vector<16x1xf32>
    %144 = arith.divf %142, %143 : vector<16x1xf32>
    %145 = vector.broadcast %137 : vector<16x1xf32> to vector<16x32xf32>
    %146 = arith.subf %129, %145 : vector<16x32xf32>
    %cst_56 = arith.constant 9.99999996E-13 : f32
    %147 = vector.broadcast %cst_56 : f32 to vector<16x1xf32>
    %148 = arith.addf %144, %147 : vector<16x1xf32>
    %149 = math.rsqrt %148 : vector<16x1xf32>
    %150 = vector.broadcast %149 : vector<16x1xf32> to vector<16x32xf32>
    %151 = arith.mulf %146, %150 : vector<16x32xf32>
    %152 = vector.broadcast %131 : vector<1x32xf32> to vector<16x32xf32>
    %153 = arith.mulf %151, %152 : vector<16x32xf32>
    %154 = vector.broadcast %133 : vector<1x32xf32> to vector<16x32xf32>
    %155 = arith.addf %153, %154 : vector<16x32xf32>
    %c0_57 = arith.constant 0 : index
    %c0_58 = arith.constant 0 : index
    %c0_59 = arith.constant 0 : index
    %156 = vector.load %arg11[%c0_57, %c0_58, %c0_59] : memref<2x32x64xf32, #tpu.memory_space<vmem>>, vector<1x32x64xf32>
    %157 = vector.shape_cast %156 : vector<1x32x64xf32> to vector<32x64xf32>
    %cst_60 = arith.constant dense<0.000000e+00> : vector<16x64xf32>
    %158 = tpu.matmul %155, %157, %cst_60 {dimension_numbers = #tpu.dot_dimension_numbers<[1], [0], [0], [1], [0, 0, 1, 1], [], []>} : vector<16x32xf32>, vector<32x64xf32>, vector<16x64xf32> -> vector<16x64xf32>
    %c0_61 = arith.constant 0 : index
    %c0_62 = arith.constant 0 : index
    %c0_63 = arith.constant 0 : index
    %159 = vector.load %arg12[%c0_61, %c0_62, %c0_63] : memref<2x1x64xf32, #tpu.memory_space<vmem>>, vector<1x1x64xf32>
    %160 = vector.shape_cast %159 : vector<1x1x64xf32> to vector<1x64xf32>
    %161 = vector.broadcast %160 : vector<1x64xf32> to vector<16x64xf32>
    %162 = arith.addf %158, %161 : vector<16x64xf32>
    %cst_64 = arith.constant 5.000000e-01 : f32
    %163 = vector.broadcast %cst_64 : f32 to vector<16x64xf32>
    %164 = arith.mulf %163, %162 : vector<16x64xf32>
    %cst_65 = arith.constant 4.471500e-02 : f32
    %165 = vector.broadcast %cst_65 : f32 to vector<16x64xf32>
    %166 = arith.mulf %165, %162 : vector<16x64xf32>
    %167 = arith.mulf %166, %162 : vector<16x64xf32>
    %168 = arith.mulf %167, %162 : vector<16x64xf32>
    %169 = arith.addf %162, %168 : vector<16x64xf32>
    %cst_66 = arith.constant 0.797884583 : f32
    %170 = vector.broadcast %cst_66 : f32 to vector<16x64xf32>
    %171 = arith.mulf %170, %169 : vector<16x64xf32>
    %172 = math.tanh %171 : vector<16x64xf32>
    %cst_67 = arith.constant 1.000000e+00 : f32
    %173 = vector.broadcast %cst_67 : f32 to vector<16x64xf32>
    %174 = arith.addf %173, %172 : vector<16x64xf32>
    %175 = arith.mulf %164, %174 : vector<16x64xf32>
    %c0_68 = arith.constant 0 : index
    %c0_69 = arith.constant 0 : index
    %c0_70 = arith.constant 0 : index
    %176 = vector.load %arg13[%c0_68, %c0_69, %c0_70] : memref<2x64x32xf32, #tpu.memory_space<vmem>>, vector<1x64x32xf32>
    %177 = vector.shape_cast %176 : vector<1x64x32xf32> to vector<64x32xf32>
    %cst_71 = arith.constant dense<0.000000e+00> : vector<16x32xf32>
    %178 = tpu.matmul %175, %177, %cst_71 {dimension_numbers = #tpu.dot_dimension_numbers<[1], [0], [0], [1], [0, 0, 1, 1], [], []>} : vector<16x64xf32>, vector<64x32xf32>, vector<16x32xf32> -> vector<16x32xf32>
    %c0_72 = arith.constant 0 : index
    %c0_73 = arith.constant 0 : index
    %c0_74 = arith.constant 0 : index
    %179 = vector.load %arg14[%c0_72, %c0_73, %c0_74] : memref<2x1x32xf32, #tpu.memory_space<vmem>>, vector<1x1x32xf32>
    %180 = vector.shape_cast %179 : vector<1x1x32xf32> to vector<1x32xf32>
    %181 = vector.broadcast %180 : vector<1x32xf32> to vector<16x32xf32>
    %182 = arith.addf %178, %181 : vector<16x32xf32>
    %183 = arith.addf %182, %155 : vector<16x32xf32>
    %c0_75 = arith.constant 0 : index
    %c0_76 = arith.constant 0 : index
    %c0_77 = arith.constant 0 : index
    %184 = vector.load %arg15[%c0_75, %c0_76, %c0_77] : memref<2x1x32xf32, #tpu.memory_space<vmem>>, vector<1x1x32xf32>
    %185 = vector.shape_cast %184 : vector<1x1x32xf32> to vector<1x32xf32>
    %c0_78 = arith.constant 0 : index
    %c0_79 = arith.constant 0 : index
    %c0_80 = arith.constant 0 : index
    %186 = vector.load %arg16[%c0_78, %c0_79, %c0_80] : memref<2x1x32xf32, #tpu.memory_space<vmem>>, vector<1x1x32xf32>
    %187 = vector.shape_cast %186 : vector<1x1x32xf32> to vector<1x32xf32>
    %cst_81 = arith.constant dense<0.000000e+00> : vector<16xf32>
    %188 = vector.multi_reduction <add>, %183, %cst_81 [1] : vector<16x32xf32> to vector<16xf32>
    %189 = vector.shape_cast %188 : vector<16xf32> to vector<16x1xf32>
    %cst_82 = arith.constant 3.200000e+01 : f32
    %190 = vector.broadcast %cst_82 : f32 to vector<16x1xf32>
    %191 = arith.divf %189, %190 : vector<16x1xf32>
    %192 = vector.broadcast %191 : vector<16x1xf32> to vector<16x32xf32>
    %193 = arith.subf %183, %192 : vector<16x32xf32>
    %194 = arith.mulf %193, %193 : vector<16x32xf32>
    %cst_83 = arith.constant dense<0.000000e+00> : vector<16xf32>
    %195 = vector.multi_reduction <add>, %194, %cst_83 [1] : vector<16x32xf32> to vector<16xf32>
    %196 = vector.shape_cast %195 : vector<16xf32> to vector<16x1xf32>
    %cst_84 = arith.constant 3.200000e+01 : f32
    %197 = vector.broadcast %cst_84 : f32 to vector<16x1xf32>
    %198 = arith.divf %196, %197 : vector<16x1xf32>
    %199 = vector.broadcast %191 : vector<16x1xf32> to vector<16x32xf32>
    %200 = arith.subf %183, %199 : vector<16x32xf32>
    %cst_85 = arith.constant 9.99999996E-13 : f32
    %201 = vector.broadcast %cst_85 : f32 to vector<16x1xf32>
    %202 = arith.addf %198, %201 : vector<16x1xf32>
    %203 = math.rsqrt %202 : vector<16x1xf32>
    %204 = vector.broadcast %203 : vector<16x1xf32> to vector<16x32xf32>
    %205 = arith.mulf %200, %204 : vector<16x32xf32>
    %206 = vector.broadcast %185 : vector<1x32xf32> to vector<16x32xf32>
    %207 = arith.mulf %205, %206 : vector<16x32xf32>
    %208 = vector.broadcast %187 : vector<1x32xf32> to vector<16x32xf32>
    %209 = arith.addf %207, %208 : vector<16x32xf32>
    %c1 = arith.constant 1 : index
    %c0_86 = arith.constant 0 : index
    %c0_87 = arith.constant 0 : index
    %210 = vector.load %arg5[%c1, %c0_86, %c0_87] : memref<2x32x96xf32, #tpu.memory_space<vmem>>, vector<1x32x96xf32>
    %211 = vector.shape_cast %210 : vector<1x32x96xf32> to vector<32x96xf32>
    %cst_88 = arith.constant dense<0.000000e+00> : vector<16x96xf32>
    %212 = tpu.matmul %209, %211, %cst_88 {dimension_numbers = #tpu.dot_dimension_numbers<[1], [0], [0], [1], [0, 0, 1, 1], [], []>} : vector<16x32xf32>, vector<32x96xf32>, vector<16x96xf32> -> vector<16x96xf32>
    %c1_89 = arith.constant 1 : index
    %c0_90 = arith.constant 0 : index
    %c0_91 = arith.constant 0 : index
    %213 = vector.load %arg6[%c1_89, %c0_90, %c0_91] : memref<2x1x96xf32, #tpu.memory_space<vmem>>, vector<1x1x96xf32>
    %214 = vector.shape_cast %213 : vector<1x1x96xf32> to vector<1x96xf32>
    %215 = vector.broadcast %214 : vector<1x96xf32> to vector<16x96xf32>
    %216 = arith.addf %212, %215 : vector<16x96xf32>
    %217 = vector.extract_strided_slice %216 {offsets = [0, 0], sizes = [16, 8], strides = [1, 1]} : vector<16x96xf32> to vector<16x8xf32>
    %218 = vector.shape_cast %217 : vector<16x8xf32> to vector<2x8x8xf32>
    %219 = vector.extract_strided_slice %216 {offsets = [0, 32], sizes = [16, 8], strides = [1, 1]} : vector<16x96xf32> to vector<16x8xf32>
    %220 = vector.shape_cast %219 : vector<16x8xf32> to vector<2x8x8xf32>
    %221 = vector.extract_strided_slice %216 {offsets = [0, 64], sizes = [16, 8], strides = [1, 1]} : vector<16x96xf32> to vector<16x8xf32>
    %222 = vector.shape_cast %221 : vector<16x8xf32> to vector<2x8x8xf32>
    "tpu.trace_start"() <{level = 10 : i32, message = "bqd,bkd->bqk"}> : () -> ()
    %cst_92 = arith.constant dense<0.000000e+00> : vector<2x8x8xf32>
    %223 = tpu.matmul %218, %220, %cst_92 {dimension_numbers = #tpu.dot_dimension_numbers<[2], [2], [1], [1], [0, 0, 0, 1, 1, 1], [0], [0]>} : vector<2x8x8xf32>, vector<2x8x8xf32>, vector<2x8x8xf32> -> vector<2x8x8xf32>
    "tpu.trace_stop"() : () -> ()
    %cst_93 = arith.constant 0.353553385 : f32
    %224 = vector.broadcast %cst_93 : f32 to vector<2x8x8xf32>
    %225 = arith.mulf %223, %224 : vector<2x8x8xf32>
    %226 = arith.addf %225, %25 : vector<2x8x8xf32>
    %cst_94 = arith.constant dense<0xFF800000> : vector<2x8xf32>
    %227 = vector.multi_reduction <maximumf>, %226, %cst_94 [2] : vector<2x8x8xf32> to vector<2x8xf32>
    %228 = vector.shape_cast %227 : vector<2x8xf32> to vector<2x8x1xf32>
    %229 = vector.broadcast %228 : vector<2x8x1xf32> to vector<2x8x8xf32>
    %230 = arith.subf %226, %229 : vector<2x8x8xf32>
    %231 = math.exp %230 : vector<2x8x8xf32>
    %cst_95 = arith.constant dense<0.000000e+00> : vector<2x8xf32>
    %232 = vector.multi_reduction <add>, %231, %cst_95 [2] : vector<2x8x8xf32> to vector<2x8xf32>
    %233 = vector.shape_cast %232 : vector<2x8xf32> to vector<2x8x1xf32>
    %234 = tpu.reciprocal %233 {approx = true} : vector<2x8x1xf32> -> vector<2x8x1xf32>
    %235 = vector.broadcast %234 : vector<2x8x1xf32> to vector<2x8x8xf32>
    %236 = arith.mulf %231, %235 : vector<2x8x8xf32>
    "tpu.trace_start"() <{level = 10 : i32, message = "bqk,bkd->bqd"}> : () -> ()
    %cst_96 = arith.constant dense<0.000000e+00> : vector<2x8x8xf32>
    %237 = tpu.matmul %236, %222, %cst_96 {dimension_numbers = #tpu.dot_dimension_numbers<[2], [1], [1], [2], [0, 0, 0, 1, 1, 2], [0], [0]>} : vector<2x8x8xf32>, vector<2x8x8xf32>, vector<2x8x8xf32> -> vector<2x8x8xf32>
    "tpu.trace_stop"() : () -> ()
    %238 = vector.shape_cast %237 : vector<2x8x8xf32> to vector<16x8xf32>
    %239 = vector.extract_strided_slice %216 {offsets = [0, 8], sizes = [16, 8], strides = [1, 1]} : vector<16x96xf32> to vector<16x8xf32>
    %240 = vector.shape_cast %239 : vector<16x8xf32> to vector<2x8x8xf32>
    %241 = vector.extract_strided_slice %216 {offsets = [0, 40], sizes = [16, 8], strides = [1, 1]} : vector<16x96xf32> to vector<16x8xf32>
    %242 = vector.shape_cast %241 : vector<16x8xf32> to vector<2x8x8xf32>
    %243 = vector.extract_strided_slice %216 {offsets = [0, 72], sizes = [16, 8], strides = [1, 1]} : vector<16x96xf32> to vector<16x8xf32>
    %244 = vector.shape_cast %243 : vector<16x8xf32> to vector<2x8x8xf32>
    "tpu.trace_start"() <{level = 10 : i32, message = "bqd,bkd->bqk"}> : () -> ()
    %cst_97 = arith.constant dense<0.000000e+00> : vector<2x8x8xf32>
    %245 = tpu.matmul %240, %242, %cst_97 {dimension_numbers = #tpu.dot_dimension_numbers<[2], [2], [1], [1], [0, 0, 0, 1, 1, 1], [0], [0]>} : vector<2x8x8xf32>, vector<2x8x8xf32>, vector<2x8x8xf32> -> vector<2x8x8xf32>
    "tpu.trace_stop"() : () -> ()
    %cst_98 = arith.constant 0.353553385 : f32
    %246 = vector.broadcast %cst_98 : f32 to vector<2x8x8xf32>
    %247 = arith.mulf %245, %246 : vector<2x8x8xf32>
    %248 = arith.addf %247, %25 : vector<2x8x8xf32>
    %cst_99 = arith.constant dense<0xFF800000> : vector<2x8xf32>
    %249 = vector.multi_reduction <maximumf>, %248, %cst_99 [2] : vector<2x8x8xf32> to vector<2x8xf32>
    %250 = vector.shape_cast %249 : vector<2x8xf32> to vector<2x8x1xf32>
    %251 = vector.broadcast %250 : vector<2x8x1xf32> to vector<2x8x8xf32>
    %252 = arith.subf %248, %251 : vector<2x8x8xf32>
    %253 = math.exp %252 : vector<2x8x8xf32>
    %cst_100 = arith.constant dense<0.000000e+00> : vector<2x8xf32>
    %254 = vector.multi_reduction <add>, %253, %cst_100 [2] : vector<2x8x8xf32> to vector<2x8xf32>
    %255 = vector.shape_cast %254 : vector<2x8xf32> to vector<2x8x1xf32>
    %256 = tpu.reciprocal %255 {approx = true} : vector<2x8x1xf32> -> vector<2x8x1xf32>
    %257 = vector.broadcast %256 : vector<2x8x1xf32> to vector<2x8x8xf32>
    %258 = arith.mulf %253, %257 : vector<2x8x8xf32>
    "tpu.trace_start"() <{level = 10 : i32, message = "bqk,bkd->bqd"}> : () -> ()
    %cst_101 = arith.constant dense<0.000000e+00> : vector<2x8x8xf32>
    %259 = tpu.matmul %258, %244, %cst_101 {dimension_numbers = #tpu.dot_dimension_numbers<[2], [1], [1], [2], [0, 0, 0, 1, 1, 2], [0], [0]>} : vector<2x8x8xf32>, vector<2x8x8xf32>, vector<2x8x8xf32> -> vector<2x8x8xf32>
    "tpu.trace_stop"() : () -> ()
    %260 = vector.shape_cast %259 : vector<2x8x8xf32> to vector<16x8xf32>
    %261 = vector.extract_strided_slice %216 {offsets = [0, 16], sizes = [16, 8], strides = [1, 1]} : vector<16x96xf32> to vector<16x8xf32>
    %262 = vector.shape_cast %261 : vector<16x8xf32> to vector<2x8x8xf32>
    %263 = vector.extract_strided_slice %216 {offsets = [0, 48], sizes = [16, 8], strides = [1, 1]} : vector<16x96xf32> to vector<16x8xf32>
    %264 = vector.shape_cast %263 : vector<16x8xf32> to vector<2x8x8xf32>
    %265 = vector.extract_strided_slice %216 {offsets = [0, 80], sizes = [16, 8], strides = [1, 1]} : vector<16x96xf32> to vector<16x8xf32>
    %266 = vector.shape_cast %265 : vector<16x8xf32> to vector<2x8x8xf32>
    "tpu.trace_start"() <{level = 10 : i32, message = "bqd,bkd->bqk"}> : () -> ()
    %cst_102 = arith.constant dense<0.000000e+00> : vector<2x8x8xf32>
    %267 = tpu.matmul %262, %264, %cst_102 {dimension_numbers = #tpu.dot_dimension_numbers<[2], [2], [1], [1], [0, 0, 0, 1, 1, 1], [0], [0]>} : vector<2x8x8xf32>, vector<2x8x8xf32>, vector<2x8x8xf32> -> vector<2x8x8xf32>
    "tpu.trace_stop"() : () -> ()
    %cst_103 = arith.constant 0.353553385 : f32
    %268 = vector.broadcast %cst_103 : f32 to vector<2x8x8xf32>
    %269 = arith.mulf %267, %268 : vector<2x8x8xf32>
    %270 = arith.addf %269, %25 : vector<2x8x8xf32>
    %cst_104 = arith.constant dense<0xFF800000> : vector<2x8xf32>
    %271 = vector.multi_reduction <maximumf>, %270, %cst_104 [2] : vector<2x8x8xf32> to vector<2x8xf32>
    %272 = vector.shape_cast %271 : vector<2x8xf32> to vector<2x8x1xf32>
    %273 = vector.broadcast %272 : vector<2x8x1xf32> to vector<2x8x8xf32>
    %274 = arith.subf %270, %273 : vector<2x8x8xf32>
    %275 = math.exp %274 : vector<2x8x8xf32>
    %cst_105 = arith.constant dense<0.000000e+00> : vector<2x8xf32>
    %276 = vector.multi_reduction <add>, %275, %cst_105 [2] : vector<2x8x8xf32> to vector<2x8xf32>
    %277 = vector.shape_cast %276 : vector<2x8xf32> to vector<2x8x1xf32>
    %278 = tpu.reciprocal %277 {approx = true} : vector<2x8x1xf32> -> vector<2x8x1xf32>
    %279 = vector.broadcast %278 : vector<2x8x1xf32> to vector<2x8x8xf32>
    %280 = arith.mulf %275, %279 : vector<2x8x8xf32>
    "tpu.trace_start"() <{level = 10 : i32, message = "bqk,bkd->bqd"}> : () -> ()
    %cst_106 = arith.constant dense<0.000000e+00> : vector<2x8x8xf32>
    %281 = tpu.matmul %280, %266, %cst_106 {dimension_numbers = #tpu.dot_dimension_numbers<[2], [1], [1], [2], [0, 0, 0, 1, 1, 2], [0], [0]>} : vector<2x8x8xf32>, vector<2x8x8xf32>, vector<2x8x8xf32> -> vector<2x8x8xf32>
    "tpu.trace_stop"() : () -> ()
    %282 = vector.shape_cast %281 : vector<2x8x8xf32> to vector<16x8xf32>
    %283 = vector.extract_strided_slice %216 {offsets = [0, 24], sizes = [16, 8], strides = [1, 1]} : vector<16x96xf32> to vector<16x8xf32>
    %284 = vector.shape_cast %283 : vector<16x8xf32> to vector<2x8x8xf32>
    %285 = vector.extract_strided_slice %216 {offsets = [0, 56], sizes = [16, 8], strides = [1, 1]} : vector<16x96xf32> to vector<16x8xf32>
    %286 = vector.shape_cast %285 : vector<16x8xf32> to vector<2x8x8xf32>
    %287 = vector.extract_strided_slice %216 {offsets = [0, 88], sizes = [16, 8], strides = [1, 1]} : vector<16x96xf32> to vector<16x8xf32>
    %288 = vector.shape_cast %287 : vector<16x8xf32> to vector<2x8x8xf32>
    "tpu.trace_start"() <{level = 10 : i32, message = "bqd,bkd->bqk"}> : () -> ()
    %cst_107 = arith.constant dense<0.000000e+00> : vector<2x8x8xf32>
    %289 = tpu.matmul %284, %286, %cst_107 {dimension_numbers = #tpu.dot_dimension_numbers<[2], [2], [1], [1], [0, 0, 0, 1, 1, 1], [0], [0]>} : vector<2x8x8xf32>, vector<2x8x8xf32>, vector<2x8x8xf32> -> vector<2x8x8xf32>
    "tpu.trace_stop"() : () -> ()
    %cst_108 = arith.constant 0.353553385 : f32
    %290 = vector.broadcast %cst_108 : f32 to vector<2x8x8xf32>
    %291 = arith.mulf %289, %290 : vector<2x8x8xf32>
    %292 = arith.addf %291, %25 : vector<2x8x8xf32>
    %cst_109 = arith.constant dense<0xFF800000> : vector<2x8xf32>
    %293 = vector.multi_reduction <maximumf>, %292, %cst_109 [2] : vector<2x8x8xf32> to vector<2x8xf32>
    %294 = vector.shape_cast %293 : vector<2x8xf32> to vector<2x8x1xf32>
    %295 = vector.broadcast %294 : vector<2x8x1xf32> to vector<2x8x8xf32>
    %296 = arith.subf %292, %295 : vector<2x8x8xf32>
    %297 = math.exp %296 : vector<2x8x8xf32>
    %cst_110 = arith.constant dense<0.000000e+00> : vector<2x8xf32>
    %298 = vector.multi_reduction <add>, %297, %cst_110 [2] : vector<2x8x8xf32> to vector<2x8xf32>
    %299 = vector.shape_cast %298 : vector<2x8xf32> to vector<2x8x1xf32>
    %300 = tpu.reciprocal %299 {approx = true} : vector<2x8x1xf32> -> vector<2x8x1xf32>
    %301 = vector.broadcast %300 : vector<2x8x1xf32> to vector<2x8x8xf32>
    %302 = arith.mulf %297, %301 : vector<2x8x8xf32>
    "tpu.trace_start"() <{level = 10 : i32, message = "bqk,bkd->bqd"}> : () -> ()
    %cst_111 = arith.constant dense<0.000000e+00> : vector<2x8x8xf32>
    %303 = tpu.matmul %302, %288, %cst_111 {dimension_numbers = #tpu.dot_dimension_numbers<[2], [1], [1], [2], [0, 0, 0, 1, 1, 2], [0], [0]>} : vector<2x8x8xf32>, vector<2x8x8xf32>, vector<2x8x8xf32> -> vector<2x8x8xf32>
    "tpu.trace_stop"() : () -> ()
    %304 = vector.shape_cast %303 : vector<2x8x8xf32> to vector<16x8xf32>
    %305 = tpu.concatenate %238, %260, %282, %304 in 1 : vector<16x8xf32>, vector<16x8xf32>, vector<16x8xf32>, vector<16x8xf32> -> vector<16x32xf32>
    %c1_112 = arith.constant 1 : index
    %c0_113 = arith.constant 0 : index
    %c0_114 = arith.constant 0 : index
    %306 = vector.load %arg7[%c1_112, %c0_113, %c0_114] : memref<2x32x32xf32, #tpu.memory_space<vmem>>, vector<1x32x32xf32>
    %307 = vector.shape_cast %306 : vector<1x32x32xf32> to vector<32x32xf32>
    %cst_115 = arith.constant dense<0.000000e+00> : vector<16x32xf32>
    %308 = tpu.matmul %305, %307, %cst_115 {dimension_numbers = #tpu.dot_dimension_numbers<[1], [0], [0], [1], [0, 0, 1, 1], [], []>} : vector<16x32xf32>, vector<32x32xf32>, vector<16x32xf32> -> vector<16x32xf32>
    %c1_116 = arith.constant 1 : index
    %c0_117 = arith.constant 0 : index
    %c0_118 = arith.constant 0 : index
    %309 = vector.load %arg8[%c1_116, %c0_117, %c0_118] : memref<2x1x32xf32, #tpu.memory_space<vmem>>, vector<1x1x32xf32>
    %310 = vector.shape_cast %309 : vector<1x1x32xf32> to vector<1x32xf32>
    %311 = vector.broadcast %310 : vector<1x32xf32> to vector<16x32xf32>
    %312 = arith.addf %308, %311 : vector<16x32xf32>
    %313 = arith.addf %312, %209 : vector<16x32xf32>
    %c1_119 = arith.constant 1 : index
    %c0_120 = arith.constant 0 : index
    %c0_121 = arith.constant 0 : index
    %314 = vector.load %arg9[%c1_119, %c0_120, %c0_121] : memref<2x1x32xf32, #tpu.memory_space<vmem>>, vector<1x1x32xf32>
    %315 = vector.shape_cast %314 : vector<1x1x32xf32> to vector<1x32xf32>
    %c1_122 = arith.constant 1 : index
    %c0_123 = arith.constant 0 : index
    %c0_124 = arith.constant 0 : index
    %316 = vector.load %arg10[%c1_122, %c0_123, %c0_124] : memref<2x1x32xf32, #tpu.memory_space<vmem>>, vector<1x1x32xf32>
    %317 = vector.shape_cast %316 : vector<1x1x32xf32> to vector<1x32xf32>
    %cst_125 = arith.constant dense<0.000000e+00> : vector<16xf32>
    %318 = vector.multi_reduction <add>, %313, %cst_125 [1] : vector<16x32xf32> to vector<16xf32>
    %319 = vector.shape_cast %318 : vector<16xf32> to vector<16x1xf32>
    %cst_126 = arith.constant 3.200000e+01 : f32
    %320 = vector.broadcast %cst_126 : f32 to vector<16x1xf32>
    %321 = arith.divf %319, %320 : vector<16x1xf32>
    %322 = vector.broadcast %321 : vector<16x1xf32> to vector<16x32xf32>
    %323 = arith.subf %313, %322 : vector<16x32xf32>
    %324 = arith.mulf %323, %323 : vector<16x32xf32>
    %cst_127 = arith.constant dense<0.000000e+00> : vector<16xf32>
    %325 = vector.multi_reduction <add>, %324, %cst_127 [1] : vector<16x32xf32> to vector<16xf32>
    %326 = vector.shape_cast %325 : vector<16xf32> to vector<16x1xf32>
    %cst_128 = arith.constant 3.200000e+01 : f32
    %327 = vector.broadcast %cst_128 : f32 to vector<16x1xf32>
    %328 = arith.divf %326, %327 : vector<16x1xf32>
    %329 = vector.broadcast %321 : vector<16x1xf32> to vector<16x32xf32>
    %330 = arith.subf %313, %329 : vector<16x32xf32>
    %cst_129 = arith.constant 9.99999996E-13 : f32
    %331 = vector.broadcast %cst_129 : f32 to vector<16x1xf32>
    %332 = arith.addf %328, %331 : vector<16x1xf32>
    %333 = math.rsqrt %332 : vector<16x1xf32>
    %334 = vector.broadcast %333 : vector<16x1xf32> to vector<16x32xf32>
    %335 = arith.mulf %330, %334 : vector<16x32xf32>
    %336 = vector.broadcast %315 : vector<1x32xf32> to vector<16x32xf32>
    %337 = arith.mulf %335, %336 : vector<16x32xf32>
    %338 = vector.broadcast %317 : vector<1x32xf32> to vector<16x32xf32>
    %339 = arith.addf %337, %338 : vector<16x32xf32>
    %c1_130 = arith.constant 1 : index
    %c0_131 = arith.constant 0 : index
    %c0_132 = arith.constant 0 : index
    %340 = vector.load %arg11[%c1_130, %c0_131, %c0_132] : memref<2x32x64xf32, #tpu.memory_space<vmem>>, vector<1x32x64xf32>
    %341 = vector.shape_cast %340 : vector<1x32x64xf32> to vector<32x64xf32>
    %cst_133 = arith.constant dense<0.000000e+00> : vector<16x64xf32>
    %342 = tpu.matmul %339, %341, %cst_133 {dimension_numbers = #tpu.dot_dimension_numbers<[1], [0], [0], [1], [0, 0, 1, 1], [], []>} : vector<16x32xf32>, vector<32x64xf32>, vector<16x64xf32> -> vector<16x64xf32>
    %c1_134 = arith.constant 1 : index
    %c0_135 = arith.constant 0 : index
    %c0_136 = arith.constant 0 : index
    %343 = vector.load %arg12[%c1_134, %c0_135, %c0_136] : memref<2x1x64xf32, #tpu.memory_space<vmem>>, vector<1x1x64xf32>
    %344 = vector.shape_cast %343 : vector<1x1x64xf32> to vector<1x64xf32>
    %345 = vector.broadcast %344 : vector<1x64xf32> to vector<16x64xf32>
    %346 = arith.addf %342, %345 : vector<16x64xf32>
    %cst_137 = arith.constant 5.000000e-01 : f32
    %347 = vector.broadcast %cst_137 : f32 to vector<16x64xf32>
    %348 = arith.mulf %347, %346 : vector<16x64xf32>
    %cst_138 = arith.constant 4.471500e-02 : f32
    %349 = vector.broadcast %cst_138 : f32 to vector<16x64xf32>
    %350 = arith.mulf %349, %346 : vector<16x64xf32>
    %351 = arith.mulf %350, %346 : vector<16x64xf32>
    %352 = arith.mulf %351, %346 : vector<16x64xf32>
    %353 = arith.addf %346, %352 : vector<16x64xf32>
    %cst_139 = arith.constant 0.797884583 : f32
    %354 = vector.broadcast %cst_139 : f32 to vector<16x64xf32>
    %355 = arith.mulf %354, %353 : vector<16x64xf32>
    %356 = math.tanh %355 : vector<16x64xf32>
    %cst_140 = arith.constant 1.000000e+00 : f32
    %357 = vector.broadcast %cst_140 : f32 to vector<16x64xf32>
    %358 = arith.addf %357, %356 : vector<16x64xf32>
    %359 = arith.mulf %348, %358 : vector<16x64xf32>
    %c1_141 = arith.constant 1 : index
    %c0_142 = arith.constant 0 : index
    %c0_143 = arith.constant 0 : index
    %360 = vector.load %arg13[%c1_141, %c0_142, %c0_143] : memref<2x64x32xf32, #tpu.memory_space<vmem>>, vector<1x64x32xf32>
    %361 = vector.shape_cast %360 : vector<1x64x32xf32> to vector<64x32xf32>
    %cst_144 = arith.constant dense<0.000000e+00> : vector<16x32xf32>
    %362 = tpu.matmul %359, %361, %cst_144 {dimension_numbers = #tpu.dot_dimension_numbers<[1], [0], [0], [1], [0, 0, 1, 1], [], []>} : vector<16x64xf32>, vector<64x32xf32>, vector<16x32xf32> -> vector<16x32xf32>
    %c1_145 = arith.constant 1 : index
    %c0_146 = arith.constant 0 : index
    %c0_147 = arith.constant 0 : index
    %363 = vector.load %arg14[%c1_145, %c0_146, %c0_147] : memref<2x1x32xf32, #tpu.memory_space<vmem>>, vector<1x1x32xf32>
    %364 = vector.shape_cast %363 : vector<1x1x32xf32> to vector<1x32xf32>
    %365 = vector.broadcast %364 : vector<1x32xf32> to vector<16x32xf32>
    %366 = arith.addf %362, %365 : vector<16x32xf32>
    %367 = arith.addf %366, %339 : vector<16x32xf32>
    %c1_148 = arith.constant 1 : index
    %c0_149 = arith.constant 0 : index
    %c0_150 = arith.constant 0 : index
    %368 = vector.load %arg15[%c1_148, %c0_149, %c0_150] : memref<2x1x32xf32, #tpu.memory_space<vmem>>, vector<1x1x32xf32>
    %369 = vector.shape_cast %368 : vector<1x1x32xf32> to vector<1x32xf32>
    %c1_151 = arith.constant 1 : index
    %c0_152 = arith.constant 0 : index
    %c0_153 = arith.constant 0 : index
    %370 = vector.load %arg16[%c1_151, %c0_152, %c0_153] : memref<2x1x32xf32, #tpu.memory_space<vmem>>, vector<1x1x32xf32>
    %371 = vector.shape_cast %370 : vector<1x1x32xf32> to vector<1x32xf32>
    %cst_154 = arith.constant dense<0.000000e+00> : vector<16xf32>
    %372 = vector.multi_reduction <add>, %367, %cst_154 [1] : vector<16x32xf32> to vector<16xf32>
    %373 = vector.shape_cast %372 : vector<16xf32> to vector<16x1xf32>
    %cst_155 = arith.constant 3.200000e+01 : f32
    %374 = vector.broadcast %cst_155 : f32 to vector<16x1xf32>
    %375 = arith.divf %373, %374 : vector<16x1xf32>
    %376 = vector.broadcast %375 : vector<16x1xf32> to vector<16x32xf32>
    %377 = arith.subf %367, %376 : vector<16x32xf32>
    %378 = arith.mulf %377, %377 : vector<16x32xf32>
    %cst_156 = arith.constant dense<0.000000e+00> : vector<16xf32>
    %379 = vector.multi_reduction <add>, %378, %cst_156 [1] : vector<16x32xf32> to vector<16xf32>
    %380 = vector.shape_cast %379 : vector<16xf32> to vector<16x1xf32>
    %cst_157 = arith.constant 3.200000e+01 : f32
    %381 = vector.broadcast %cst_157 : f32 to vector<16x1xf32>
    %382 = arith.divf %380, %381 : vector<16x1xf32>
    %383 = vector.broadcast %375 : vector<16x1xf32> to vector<16x32xf32>
    %384 = arith.subf %367, %383 : vector<16x32xf32>
    %cst_158 = arith.constant 9.99999996E-13 : f32
    %385 = vector.broadcast %cst_158 : f32 to vector<16x1xf32>
    %386 = arith.addf %382, %385 : vector<16x1xf32>
    %387 = math.rsqrt %386 : vector<16x1xf32>
    %388 = vector.broadcast %387 : vector<16x1xf32> to vector<16x32xf32>
    %389 = arith.mulf %384, %388 : vector<16x32xf32>
    %390 = vector.broadcast %369 : vector<1x32xf32> to vector<16x32xf32>
    %391 = arith.mulf %389, %390 : vector<16x32xf32>
    %392 = vector.broadcast %371 : vector<1x32xf32> to vector<16x32xf32>
    %393 = arith.addf %391, %392 : vector<16x32xf32>
    %c0_159 = arith.constant 0 : index
    %c0_160 = arith.constant 0 : index
    %394 = vector.load %arg2[%c0_159, %c0_160] : memref<2x16xf32, #tpu.memory_space<vmem>>, vector<2x16xf32>
    %cst_161 = arith.constant dense<0.000000e+00> : vector<2x32xf32>
    %395 = tpu.matmul %394, %393, %cst_161 {dimension_numbers = #tpu.dot_dimension_numbers<[1], [0], [0], [1], [0, 0, 1, 1], [], []>} : vector<2x16xf32>, vector<16x32xf32>, vector<2x32xf32> -> vector<2x32xf32>
    %c0_162 = arith.constant 0 : index
    %c0_163 = arith.constant 0 : index
    %396 = vector.load %arg17[%c0_162, %c0_163] : memref<32x32xf32, #tpu.memory_space<vmem>>, vector<32x32xf32>
    %cst_164 = arith.constant dense<0.000000e+00> : vector<2x32xf32>
    %397 = tpu.matmul %395, %396, %cst_164 {dimension_numbers = #tpu.dot_dimension_numbers<[1], [0], [0], [1], [0, 0, 1, 1], [], []>} : vector<2x32xf32>, vector<32x32xf32>, vector<2x32xf32> -> vector<2x32xf32>
    %c0_165 = arith.constant 0 : index
    %c0_166 = arith.constant 0 : index
    %398 = vector.load %arg18[%c0_165, %c0_166] : memref<1x32xf32, #tpu.memory_space<vmem>>, vector<1x32xf32>
    %399 = vector.broadcast %398 : vector<1x32xf32> to vector<2x32xf32>
    %400 = arith.addf %397, %399 : vector<2x32xf32>
    %401 = math.tanh %400 : vector<2x32xf32>
    %c0_167 = arith.constant 0 : index
    %c0_168 = arith.constant 0 : index
    %402 = vector.load %arg19[%c0_167, %c0_168] : memref<32x3xf32, #tpu.memory_space<vmem>>, vector<32x3xf32>
    %cst_169 = arith.constant dense<0.000000e+00> : vector<2x3xf32>
    %403 = tpu.matmul %401, %402, %cst_169 {dimension_numbers = #tpu.dot_dimension_numbers<[1], [0], [0], [1], [0, 0, 1, 1], [], []>} : vector<2x32xf32>, vector<32x3xf32>, vector<2x3xf32> -> vector<2x3xf32>
    %c0_170 = arith.constant 0 : index
    %c0_171 = arith.constant 0 : index
    %404 = vector.load %arg20[%c0_170, %c0_171] : memref<1x3xf32, #tpu.memory_space<vmem>>, vector<1x3xf32>
    %405 = vector.broadcast %404 : vector<1x3xf32> to vector<2x3xf32>
    %406 = arith.addf %403, %405 : vector<2x3xf32>
    %c0_172 = arith.constant 0 : index
    %c0_173 = arith.constant 0 : index
    %407 = vector.load %arg23[%c0_172, %c0_173] : memref<2x3xf32, #tpu.memory_space<vmem>>, vector<2x3xf32>
    tpu.vector_store %arg23[%c0_172, %c0_173], %406 {strides = array<i32>} : memref<2x3xf32, #tpu.memory_space<vmem>>, vector<2x3xf32>,
    %c0_174 = arith.constant 0 : index
    %c0_175 = arith.constant 0 : index
    %408 = vector.load %arg21[%c0_174, %c0_175] : memref<32x5xf32, #tpu.memory_space<vmem>>, vector<32x5xf32>
    %cst_176 = arith.constant dense<0.000000e+00> : vector<2x5xf32>
    %409 = tpu.matmul %401, %408, %cst_176 {dimension_numbers = #tpu.dot_dimension_numbers<[1], [0], [0], [1], [0, 0, 1, 1], [], []>} : vector<2x32xf32>, vector<32x5xf32>, vector<2x5xf32> -> vector<2x5xf32>
    %c0_177 = arith.constant 0 : index
    %c0_178 = arith.constant 0 : index
    %410 = vector.load %arg22[%c0_177, %c0_178] : memref<1x5xf32, #tpu.memory_space<vmem>>, vector<1x5xf32>
    %411 = vector.broadcast %410 : vector<1x5xf32> to vector<2x5xf32>
    %412 = arith.addf %409, %411 : vector<2x5xf32>
    %c0_179 = arith.constant 0 : index
    %c0_180 = arith.constant 0 : index
    %413 = vector.load %arg24[%c0_179, %c0_180] : memref<2x5xf32, #tpu.memory_space<vmem>>, vector<2x5xf32>
    tpu.vector_store %arg24[%c0_179, %c0_180], %412 {strides = array<i32>} : memref<2x5xf32, #tpu.memory_space<vmem>>, vector<2x5xf32>,
    return
  }
}

</mosaic_0001>

<bundles_post_ra>
// kernel: multitask_bert_forward_shared.1
= control target key start
LH: loop header
LB: loop body
LE: loop exit
PB: predicated region body
PF: predicated region fallthrough
CT: control target
= control target key end

     0   :  { %s3039_s0 = inlined_call_operand.vmem [shape: f32[16,32], index: 0, kind: input, shape index: {}]   ;;  %s3040_s1 = inlined_call_operand.vmem [shape: f32[2,8,8], index: 1, kind: input, shape index: {}]   ;;  %s3041_s2 = inlined_call_operand.vmem [shape: f32[2,16], index: 2, kind: input, shape index: {}]   ;;  %s3042_s3 = inlined_call_operand.vmem [shape: f32[1,32], index: 3, kind: input, shape index: {}]   ;;  %s3043_s4 = inlined_call_operand.vmem [shape: f32[1,32], index: 4, kind: input, shape index: {}]   ;;  %s3044_s5 = inlined_call_operand.vmem [shape: f32[2,32,96], index: 5, kind: input, shape index: {}]   ;;  %s3045_s6 = inlined_call_operand.vmem [shape: f32[2,1,96], index: 6, kind: input, shape index: {}]   ;;  %s3046_s7 = inlined_call_operand.vmem [shape: f32[2,32,32], index: 7, kind: input, shape index: {}]   ;;  %s3047_s8 = inlined_call_operand.vmem [shape: f32[2,1,32], index: 8, kind: input, shape index: {}]   ;;  %s3048_s9 = inlined_call_operand.vmem [shape: f32[2,1,32], index: 9, kind: input, shape index: {}]   ;;  %s3049_s10 = inlined_call_operand.vmem [shape: f32[2,1,32], index: 10, kind: input, shape index: {}]   ;;  %s3050_s11 = inlined_call_operand.vmem [shape: f32[2,32,64], index: 11, kind: input, shape index: {}]   ;;  %s3051_s12 = inlined_call_operand.vmem [shape: f32[2,1,64], index: 12, kind: input, shape index: {}]   ;;  %s3052_s13 = inlined_call_operand.vmem [shape: f32[2,64,32], index: 13, kind: input, shape index: {}]   ;;  %s3053_s14 = inlined_call_operand.vmem [shape: f32[2,1,32], index: 14, kind: input, shape index: {}]   ;;  %s3054_s15 = inlined_call_operand.vmem [shape: f32[2,1,32], index: 15, kind: input, shape index: {}]   ;;  %s3055_s16 = inlined_call_operand.vmem [shape: f32[2,1,32], index: 16, kind: input, shape index: {}]   ;;  %s3056_s17 = inlined_call_operand.vmem [shape: f32[32,32], index: 17, kind: input, shape index: {}]   ;;  %s3057_s18 = inlined_call_operand.vmem [shape: f32[1,32], index: 18, kind: input, shape index: {}]   ;;  %s3058_s19 = inlined_call_operand.vmem [shape: f32[32,3], index: 19, kind: input, shape index: {}]   ;;  %s3059_s20 = inlined_call_operand.vmem [shape: f32[1,3], index: 20, kind: input, shape index: {}]   ;;  %s3060_s21 = inlined_call_operand.vmem [shape: f32[32,5], index: 21, kind: input, shape index: {}]   ;;  %s3061_s22 = inlined_call_operand.vmem [shape: f32[1,5], index: 22, kind: input, shape index: {}]   ;;  %s3062_s23 = inlined_call_operand.hbm [shape: f32[2,3], index: 23, kind: output, shape index: {0}]   ;;  %s3063_s24 = inlined_call_operand.hbm [shape: f32[2,5], index: 24, kind: output, shape index: {1}]  }
   0x1   :  { %3092 = sst [smem:[#allocation8_spill]] %s3039_s0 }
   0x2   :  { %3093 = sst [smem:[#allocation9_spill]] %s3040_s1 }
   0x3   :  { %3094 = sst [smem:[#allocation10_spill]] %s3041_s2 }
   0x4   :  { %3095 = sst [smem:[#allocation11_spill]] %s3042_s3 }
   0x5   :  { %3096 = sst [smem:[#allocation12_spill]] %s3043_s4 }
   0x6   :  { %3097 = sst [smem:[#allocation13_spill]] %s3044_s5 }
   0x7   :  { %3098 = sst [smem:[#allocation14_spill]] %s3045_s6 }
   0x8   :  { %3099 = sst [smem:[#allocation15_spill]] %s3046_s7 }
   0x9   :  { %3100 = sst [smem:[#allocation16_spill]] %s3047_s8 }
   0xa   :  { %30 = vsyncpa [#allocation3], 0  ;;  %s3101_s27 = sld [smem:[#allocation8_spill]]  ;;  %vm82_vm0 = vcmask 261120  }
  0x10   :  { %v78_v0 = vld [vmem:[%s3101_s27] sm:$0xff]  ;;  %v79_v1 = vld [vmem:[%s3101_s27 + $0x8] sm:$0xff] }
  0x11   :  { %v83_v2 = vsel %vm82_vm0, %v78_v0, 0.0  ;;  %v86_v3 = vsel %vm82_vm0, %v79_v1, 0.0 }
  0x12   :  { %84 = vadd.xlane.f32.xlu0 %v83_v2 }
  0x13   :  { %31 = vsyncpa [#allocation5], 0  ;;  %v2325_v4 = vmov 32.0   ;;  %s3102_s0 = sld [smem:[#allocation13_spill]]  ;;  %s2326_s30 = smov 96   ;;  %vm186_vm8 = vcmask 64512  }
  0x14   :  { %2177 = vrcp.f32 %v2325_v4  ;;  %s3103_s26 = sld [smem:[#allocation11_spill]]  ;;  %s3080_s3 = smov 120   ;;  %vm744_vm9 = vcmask 130048   ;;  %vm747_vm10 = vcmask 195584  }
  0x15   :  { %s3104_s6 = sld [smem:[#allocation12_spill]]  ;;  %s3090_s25 = smov 88  }
  0x16   :  { %s3105_s7 = sld [smem:[#allocation14_spill]]  ;;  %s3076_s8 = smov 104  }
  0x17   :  { %s3084_s4 = smov 112   ;;  %s3082_s1 = smov 72  }
  0x18   :  { %s3074_s5 = smov 80   ;;  %s3106_s28 = sld [smem:[#allocation9_spill]] }
  0x19   :  { %v149_v21 = vld [vmem:[%s3102_s0 + $0x18] sm:$0xff]  ;;  %v148_v22 = vld [vmem:[%s3102_s0 + $0x10] sm:$0xff]  ;;  %v147_v23 = vld [vmem:[%s3102_s0 + $0x8] sm:$0xff]  ;;  %s3070_s29 = smov 56   ;;  %s3072_s27 = smov 48  }
  0x1a   :  { %87 = vadd.xlane.f32.xlu0 %v86_v3  ;;  %v2178_v5 = vpop.eup %2177  ;;  %172 = vmatpush.msra.mxu0 %v149_v21  ;;  %v146_v24 = vld [vmem:[%s3102_s0] sm:$0xff]  ;;  %s3088_s2 = smov 16  }
  0x1b   :  { %v90_v6 = vmul.f32 32.0, %v2178_v5  ;;  %vm94_vm1 = vweird.f32 %v2178_v5  ;;  %v2156_v39 = vld [vmem:[%s3103_s26] ss:$0 sm:$0xff]  ;;  %s3073_s26 = smov 64  }
  0x1c   :  { %173 = vmatpush.msra.mxu0 %v148_v22  ;;  %v2157_v43 = vld [vmem:[%s3104_s6] ss:$0 sm:$0xff]  ;;  %s3078_s6 = smov 8  }
  0x1d   :  { %v91_v7 = vsub.f32 1.0, %v90_v6  ;;  %v2158_v53 = vld [vmem:[%s3105_s7] ss:$0 sm:$0xff] }
  0x1e   :  { %174 = vmatpush.msra.mxu0 %v147_v23 }
  0x1f   :  { %v92_v8 = vmul.f32 %v2178_v5, %v91_v7 }
  0x20   :  { %175 = vmatpush.msra.mxu0 %v146_v24 }
  0x21   :  { %v93_v9 = vadd.f32 %v2178_v5, %v92_v8 }
  0x23   :  { %v2475_v10 = vsel %vm94_vm1, %v2178_v5, %v93_v9  ;;  %v2565_v9 = vld [vmem:[%s3106_s28] sm:$0xff] }
  0x85   :  { %v85_v11 = vpop.xlane.xlu0 %84 }
  0x86   :  { %v96_v12 = vmul.f32 %v2475_v10, %v85_v11 }
  0x88   :  { %v98_v13 = vsub.f32 %v78_v0, %v96_v12 }
  0x8a   :  { %v100_v14 = vmul.f32 %v98_v13, %v98_v13 }
  0x8c   :  { %v102_v15 = vsel %vm82_vm0, %v100_v14, 0.0 }
  0x8d   :  { %103 = vadd.xlane.f32.xlu1 %v102_v15  ;;  %v88_v16 = vpop.xlane.xlu0 %87  ;;  %v2572_v15 = vld [vmem:[%s3106_s28 + $0x8] sm:$0xff]  ;;  %s3071_s28 = smov 40  }
  0x8e   :  { %v97_v17 = vmul.f32 %v2475_v10, %v88_v16 }
  0x90   :  { %v99_v18 = vsub.f32 %v79_v1, %v97_v17 }
  0x92   :  { %v101_v19 = vmul.f32 %v99_v18, %v99_v18 }
  0x94   :  { %v105_v20 = vsel %vm82_vm0, %v101_v19, 0.0 }
  0x95   :  { %106 = vadd.xlane.f32.xlu1 %v105_v20 }
 0x100   :  { %v104_v25 = vpop.xlane.xlu1 %103 }
 0x101   :  { %v108_v26 = vmul.f32 %v104_v25, %v2475_v10 }
 0x103   :  { %v110_v27 = vadd.f32 1e-12, %v108_v26 }
 0x105   :  { %2179 = vrsqrt.f32 %v110_v27  ;;  %vm118_vm3 = vweird.f32 %v110_v27 }
 0x108   :  { %v107_v28 = vpop.xlane.xlu1 %106 }
 0x109   :  { %v109_v29 = vmul.f32 %v107_v28, %v2475_v10 }
 0x10b   :  { %v2180_v30 = vpop.eup %2179  ;;  %v111_v31 = vadd.f32 1e-12, %v109_v29 }
 0x10c   :  { %v113_v32 = vmul.f32 %v2180_v30, %v110_v27  ;;  %vm119_vm2 = vweird.f32 %v2180_v30 }
 0x10d   :  { %2181 = vrsqrt.f32 %v111_v31  ;;  %vm120_vm4 = vmor %vm118_vm3, %vm119_vm2  ;;  %vm128_vm6 = vweird.f32 %v111_v31  ;;  %vm912_vm2 = vcmask 523264  }
 0x10e   :  { %v114_v33 = vmul.f32 %v2180_v30, %v113_v32 }
 0x110   :  { %v115_v34 = vmul.f32 0.5, %v114_v33 }
 0x112   :  { %v116_v35 = vsub.f32 1.5, %v115_v34 }
 0x113   :  { %v2182_v36 = vpop.eup %2181 }
 0x114   :  { %v117_v37 = vmul.f32 %v2180_v30, %v116_v35  ;;  %v123_v38 = vmul.f32 %v2182_v36, %v111_v31  ;;  %vm129_vm5 = vweird.f32 %v2182_v36 }
 0x115   :  { %vm130_vm7 = vmor %vm128_vm6, %vm129_vm5 }
 0x116   :  { %v121_v40 = vsel %vm120_vm4, %v2180_v30, %v117_v37  ;;  %v124_v41 = vmul.f32 %v2182_v36, %v123_v38 }
 0x117   :  { %v132_v42 = vmul.f32 %v121_v40, %v98_v13 }
 0x118   :  { %v125_v44 = vmul.f32 0.5, %v124_v41 }
 0x119   :  { %v137_v45 = vmul.f32 %v2156_v39, %v132_v42 }
 0x11a   :  { %v126_v46 = vsub.f32 1.5, %v125_v44 }
 0x11b   :  { %v2501_v47 = vadd.f32 %v2157_v43, %v137_v45 }
 0x11c   :  { %v127_v48 = vmul.f32 %v2182_v36, %v126_v46 }
 0x11d   :  { %2013 = vmatmul.msk.f32.vlgmr.msra.gmra.mxu0 %vm82_vm0, %v2501_v47 }
 0x11e   :  { %v131_v49 = vsel %vm130_vm7, %v2182_v36, %v127_v48 }
 0x11f   :  { %v133_v50 = vmul.f32 %v131_v49, %v99_v18 }
 0x121   :  { %v138_v51 = vmul.f32 %v2156_v39, %v133_v50 }
 0x123   :  { %v2505_v52 = vadd.f32 %v2157_v43, %v138_v51 }
 0x125   :  { %2014 = vmatmul.msk.f32.gmra.mxu0 %vm82_vm0, %v2505_v52 }
 0x19a   :  { %v177_v54 = vpop.f32.mrf.mxu0 }
 0x19b   :  { %v2512_v55 = vadd.f32 %v2158_v53, %v177_v54 }
 0x19d   :  { %184 = vrot.lane.b32.xlu2 %v2512_v55, %s2326_s30 }
 0x1a2   :  { %v180_v56 = vpop.f32.mrf.mxu0 }
 0x1a3   :  { %v2516_v57 = vadd.f32 %v2158_v53, %v180_v56 }
 0x1a5   :  { %344 = vrot.lane.b32.xlu1 %v2516_v57, %s3080_s3  ;;  %346 = vrot.lane.b32.xlu0 %v2516_v57, %s3090_s25  ;;  %v2131_v30 = vpack.i.bf16 %v2516_v57, %v2512_v55 }
 0x1a6   :  { %212 = vrot.lane.b32.xlu2 %v2516_v57, %s2326_s30 }
 0x1ad   :  { %584 = vrot.lane.b32.xlu1 %v2512_v55, %s3076_s8  ;;  %450 = vrot.lane.b32.xlu0 %v2512_v55, %s3084_s4 }
 0x1ae   :  { %318 = vrot.lane.b32.xlu2 %v2512_v55, %s3090_s25  ;;  %s3114_s25 = smov 80  }
 0x1b5   :  { %614 = vrot.lane.b32.xlu1 %v2516_v57, %s3082_s1  ;;  %480 = vrot.lane.b32.xlu0 %v2516_v57, %s3074_s5 }
 0x1b6   :  { %452 = vrot.lane.b32.xlu2 %v2512_v55, %s3074_s5  ;;  %s3112_s5 = smov 120  }
 0x1bd   :  { %612 = vrot.lane.b32.xlu0 %v2516_v57, %s3076_s8  ;;  %s3109_s8 = smov 88  }
 0x1be   :  { %316 = vrot.lane.b32.xlu2 %v2512_v55, %s3080_s3  ;;  %s3121_s3 = smov 24  }
 0x1c6   :  { %586 = vrot.lane.b32.xlu2 %v2512_v55, %s3082_s1  ;;  %s3110_s1 = smov 112  }
 0x1ce   :  { %478 = vrot.lane.b32.xlu2 %v2516_v57, %s3084_s4  ;;  %s3108_s4 = sld [smem:[#allocation16_spill]] }
 0x1f7   :  { %v185_v58 = vpop.permute.xlu2 %184 }
 0x1f8   :  { %2015 = vmatpush.xpose.msk.msra.mxu1 %vm186_vm8, %v185_v58 }
 0x1fb   :  { %2016 = vmatmul.msk.f32.vlgmr.msra.gmra.mxu1 %vm186_vm8, %v2512_v55 }
 0x200   :  { %v213_v59 = vpop.permute.xlu2 %212 }
 0x201   :  { %2017 = vmatpush.xpose.msk.msra.mxu2 %vm186_vm8, %v213_v59 }
 0x204   :  { %2018 = vmatmul.msk.f32.vlgmr.msra.gmra.mxu2 %vm186_vm8, %v2516_v57 }
 0x208   :  { %v319_v60 = vpop.permute.xlu2 %318 }
 0x209   :  { %2021 = vmatpush.xpose.msk.msrb.mxu1 %vm186_vm8, %v319_v60 }
 0x210   :  { %v453_v61 = vpop.permute.xlu2 %452 }
 0x217   :  { %v345_v62 = vpop.permute.xlu1 %344  ;;  %v347_v63 = vpop.permute.xlu0 %346 }
 0x218   :  { %v317_v0 = vpop.permute.xlu2 %316  ;;  %2023 = vmatpush.xpose.msk.msrb.mxu2 %vm186_vm8, %v347_v63 }
 0x219   :  { %2022 = vmatmul.msk.f32.vlgmr.msrb.gmra.mxu1 %vm186_vm8, %v317_v0 }
 0x21b   :  { %2024 = vmatmul.msk.f32.vlgmr.msrb.gmra.mxu2 %vm186_vm8, %v345_v62 }
 0x21c   :  { %2027 = vmatpush.xpose.msk.msra.mxu2 %vm186_vm8, %v453_v61 }
 0x21f   :  { %v585_v1 = vpop.permute.xlu1 %584  ;;  %v451_v2 = vpop.permute.xlu0 %450 }
 0x220   :  { %v587_v3 = vpop.permute.xlu2 %586 }
 0x221   :  { %2033 = vmatpush.xpose.msk.msrb.mxu2 %vm186_vm8, %v587_v3 }
 0x223   :  { %2028 = vmatmul.msk.f32.vlgmr.msra.gmra.mxu2 %vm186_vm8, %v451_v2 }
 0x227   :  { %v615_v4 = vpop.permute.xlu1 %614  ;;  %v481_v5 = vpop.permute.xlu0 %480 }
 0x228   :  { %2029 = vmatpush.xpose.msk.msrb.mxu0 %vm186_vm8, %v481_v5  ;;  %v479_v6 = vpop.permute.xlu2 %478 }
 0x22b   :  { %2030 = vmatmul.msk.f32.vlgmr.msrb.gmra.mxu0 %vm186_vm8, %v479_v6  ;;  %2034 = vmatmul.msk.f32.vlgmr.msrb.gmra.mxu2 %vm186_vm8, %v585_v1 }
 0x22c   :  { %2035 = vmatpush.xpose.msk.msra.mxu0 %vm186_vm8, %v615_v4 }
 0x22f   :  { %v613_v7 = vpop.permute.xlu0 %612 }
 0x233   :  { %2036 = vmatmul.msk.f32.vlgmr.msra.gmra.mxu0 %vm186_vm8, %v613_v7 }
 0x278   :  { %v208_v8 = vpop.f32.mrf.mxu1 }
 0x279   :  { %v238_v11 = vmul.f32 0.35355338, %v208_v8 }
 0x27b   :  { %v240_v12 = vadd.f32 %v238_v11, %v2565_v9 }
 0x27d   :  { %v242_v13 = vsel %vm186_vm8, %v240_v12, -inf }
 0x27e   :  { %243 = vmax.xlane.f32.xlu2 %v242_v13 }
 0x287   :  { %v235_v14 = vpop.f32.mrf.mxu2 }
 0x288   :  { %v239_v16 = vmul.f32 0.35355338, %v235_v14 }
 0x28a   :  { %v241_v17 = vadd.f32 %v239_v16, %v2572_v15 }
 0x28c   :  { %v245_v18 = vsel %vm186_vm8, %v241_v17, -inf }
 0x28d   :  { %246 = vmax.xlane.f32.xlu1 %v245_v18 }
 0x296   :  { %v341_v19 = vpop.f32.mrf.mxu1 }
 0x297   :  { %v372_v20 = vmul.f32 0.35355338, %v341_v19 }
 0x299   :  { %v374_v21 = vadd.f32 %v372_v20, %v2565_v9 }
 0x29b   :  { %v376_v22 = vsel %vm186_vm8, %v374_v21, -inf }
 0x29c   :  { %377 = vmax.xlane.f32.xlu0 %v376_v22 }
 0x29e   :  { %v369_v23 = vpop.f32.mrf.mxu2 }
 0x29f   :  { %v373_v35 = vmul.f32 0.35355338, %v369_v23 }
 0x2a1   :  { %v375_v38 = vadd.f32 %v373_v35, %v2572_v15 }
 0x2a3   :  { %v379_v39 = vsel %vm186_vm8, %v375_v38, -inf }
 0x2a6   :  { %v475_v26 = vpop.f32.mrf.mxu2 }
 0x2a7   :  { %v506_v28 = vmul.f32 0.35355338, %v475_v26 }
 0x2a8   :  { %v503_v24 = vpop.f32.mrf.mxu0 }
 0x2a9   :  { %v507_v25 = vmul.f32 0.35355338, %v503_v24  ;;  %v2584_v33 = vadd.f32 %v506_v28, %v2565_v9 }
 0x2ab   :  { %v509_v27 = vadd.f32 %v507_v25, %v2572_v15  ;;  %v510_v37 = vsel %vm186_vm8, %v2584_v33, -inf }
 0x2ad   :  { %v513_v29 = vsel %vm186_vm8, %v509_v27, -inf }
 0x2ae   :  { %514 = vmax.xlane.f32.xlu2 %v513_v29  ;;  %v609_v40 = vpop.f32.mrf.mxu2 }
 0x2af   :  { %v640_v41 = vmul.f32 0.35355338, %v609_v40 }
 0x2b0   :  { %2132 = vrot.lane.b32.xlu0 %v2131_v30, %s3070_s29  ;;  %v637_v31 = vpop.f32.mrf.mxu0  ;;  %s3086_s29 = smov 24  }
 0x2b1   :  { %v641_v32 = vmul.f32 0.35355338, %v637_v31  ;;  %v2593_v42 = vadd.f32 %v640_v41, %v2565_v9 }
 0x2b3   :  { %v643_v34 = vadd.f32 %v641_v32, %v2572_v15  ;;  %v644_v43 = vsel %vm186_vm8, %v2593_v42, -inf }
 0x2b5   :  { %v647_v36 = vsel %vm186_vm8, %v643_v34, -inf }
 0x2b6   :  { %648 = vmax.xlane.f32.xlu1 %v647_v36  ;;  %511 = vmax.xlane.f32.xlu2 %v510_v37 }
 0x2be   :  { %380 = vmax.xlane.f32.xlu1 %v379_v39 }
 0x2d7   :  { %2127 = vrot.lane.b32.xlu1 %v2131_v30, %s3073_s26  ;;  %s3107_s26 = sld [smem:[#allocation15_spill]] }
 0x2da   :  { %645 = vmax.xlane.f32.xlu0 %v644_v43 }
 0x2df   :  { %532 = vrot.lane.b32.xlu1 %v2512_v55, %s3072_s27 }
 0x2f1   :  { %v244_v44 = vpop.xlane.xlu2 %243 }
 0x2f2   :  { %v248_v45 = vsub.f32 %v240_v12, %v244_v44 }
 0x2f4   :  { %v250_v46 = vmul.f32 1.442695, %v248_v45 }
 0x2f6   :  { %2183 = vpow2.f32 %v250_v46 }
 0x2fc   :  { %v2600_v48 = vpop.eup %2183 }
 0x2fd   :  { %v254_v49 = vsel %vm186_vm8, %v2600_v48, 0.0 }
 0x2fe   :  { %255 = vadd.xlane.f32.xlu0 %v254_v49 }
 0x300   :  { %v247_v51 = vpop.xlane.xlu1 %246 }
 0x301   :  { %v249_v59 = vsub.f32 %v241_v17, %v247_v51 }
 0x303   :  { %v252_v61 = vmul.f32 1.442695, %v249_v59 }
 0x30f   :  { %v378_v50 = vpop.xlane.xlu0 %377 }
 0x310   :  { %v382_v63 = vsub.f32 %v374_v21, %v378_v50 }
 0x312   :  { %666 = vrot.lane.b32.xlu0 %v2512_v55, %s3071_s28  ;;  %v384_v3 = vmul.f32 1.442695, %v382_v63 }
 0x321   :  { %v515_v53 = vpop.xlane.xlu2 %514 }
 0x322   :  { %v2133_v54 = vpop.permute.xlu0 %2132  ;;  %v517_v56 = vsub.f32 %v509_v27, %v515_v53 }
 0x323   :  { %v2135_v58 = vunpack.i.h.bf16 %v2133_v54 }
 0x324   :  { %v520_v60 = vmul.f32 1.442695, %v517_v56 }
 0x325   :  { %445 = vmatpush.msra.mxu1 %v2135_v58 }
 0x326   :  { %2185 = vpow2.f32 %v520_v60 }
 0x327   :  { %2187 = vpow2.f32 %v252_v61 }
 0x329   :  { %v649_v62 = vpop.xlane.xlu1 %648  ;;  %v512_v4 = vpop.xlane.xlu2 %511 }
 0x32a   :  { %v651_v0 = vsub.f32 %v643_v34, %v649_v62  ;;  %v516_v11 = vsub.f32 %v2584_v33, %v512_v4  ;;  %v2134_v34 = vunpack.i.l.bf16 %v2133_v54 }
 0x32c   :  { %v2606_v1 = vpop.eup %2185  ;;  %v654_v2 = vmul.f32 1.442695, %v651_v0  ;;  %v518_v17 = vmul.f32 1.442695, %v516_v11  ;;  %v750_v11 = vld [vmem:[%s3107_s26] sm:$0xff] }
 0x32d   :  { %v525_v55 = vsel %vm186_vm8, %v2606_v1, 0.0  ;;  %v2188_v6 = vpop.eup %2187 }
 0x32e   :  { %2189 = vpow2.f32 %v654_v2  ;;  %526 = vadd.xlane.f32.xlu2 %v525_v55  ;;  %v257_v14 = vsel %vm186_vm8, %v2188_v6, 0.0 }
 0x32f   :  { %2191 = vpow2.f32 %v384_v3 }
 0x331   :  { %v381_v5 = vpop.xlane.xlu1 %380 }
 0x332   :  { %v383_v7 = vsub.f32 %v375_v38, %v381_v5 }
 0x334   :  { %v2610_v8 = vpop.eup %2189  ;;  %v386_v12 = vmul.f32 1.442695, %v383_v7  ;;  %v752_v7 = vld [vmem:[%s3107_s26 + $0x10] sm:$0xff] }
 0x335   :  { %v659_v13 = vsel %vm186_vm8, %v2610_v8, 0.0  ;;  %v2192_v16 = vpop.eup %2191 }
 0x336   :  { %2193 = vpow2.f32 %v386_v12  ;;  %660 = vadd.xlane.f32.xlu1 %v659_v13  ;;  %258 = vadd.xlane.f32.xlu2 %v257_v14  ;;  %v388_v18 = vsel %vm186_vm8, %v2192_v16, 0.0 }
 0x337   :  { %2195 = vpow2.f32 %v518_v17 }
 0x33c   :  { %v2194_v19 = vpop.eup %2193  ;;  %389 = vadd.xlane.f32.xlu0 %v388_v18 }
 0x33d   :  { %v391_v20 = vsel %vm186_vm8, %v2194_v19, 0.0  ;;  %v2196_v21 = vpop.eup %2195 }
 0x33e   :  { %392 = vadd.xlane.f32.xlu2 %v391_v20  ;;  %v522_v22 = vsel %vm186_vm8, %v2196_v21, 0.0 }
 0x346   :  { %523 = vadd.xlane.f32.xlu2 %v522_v22 }
 0x349   :  { %v2128_v23 = vpop.permute.xlu1 %2127 }
 0x34a   :  { %v2129_v24 = vunpack.i.l.bf16 %v2128_v23  ;;  %v2130_v25 = vunpack.i.h.bf16 %v2128_v23 }
 0x34c   :  { %285 = vmatpush.msra.mxu3 %v2129_v24 }
 0x34d   :  { %v646_v26 = vpop.xlane.xlu0 %645 }
 0x34e   :  { %311 = vmatpush.msrb.mxu3 %v2130_v25  ;;  %v650_v27 = vsub.f32 %v2593_v42, %v646_v26  ;;  %v2159_v25 = vld [vmem:[%s3108_s4] ss:$0 sm:$0xff] }
 0x350   :  { %v652_v28 = vmul.f32 1.442695, %v650_v27  ;;  %692 = vrot.lane.b32.xlu0 %v2516_v57, %s3071_s28  ;;  %s3119_s28 = smov 8  }
 0x351   :  { %v533_v42 = vpop.permute.xlu1 %532 }
 0x352   :  { %2197 = vpow2.f32 %v652_v28 }
 0x358   :  { %v2198_v29 = vpop.eup %2197 }
 0x359   :  { %v656_v30 = vsel %vm186_vm8, %v2198_v29, 0.0 }
 0x35a   :  { %657 = vadd.xlane.f32.xlu2 %v656_v30 }
 0x371   :  { %v256_v31 = vpop.xlane.xlu0 %255 }
 0x372   :  { %2199 = vrcp.f32 %v256_v31  ;;  %558 = vrot.lane.b32.xlu2 %v2516_v57, %s3072_s27  ;;  %s3117_s27 = smov 40  }
 0x378   :  { %v2200_v32 = vpop.eup %2199 }
 0x379   :  { %v262_v33 = vmul.f32 %v2200_v32, %v2600_v48 }
 0x37b   :  { %2019 = vmatmul.msk.f32.vlgmr.msra.gmra.mxu3 %vm186_vm8, %v262_v33 }
 0x37c   :  { %419 = vmatpush.msra.mxu3 %v2134_v34 }
 0x384   :  { %v667_v36 = vpop.permute.xlu0 %666 }
 0x3a1   :  { %v527_v35 = vpop.xlane.xlu2 %526 }
 0x3a9   :  { %v259_v37 = vpop.xlane.xlu2 %258  ;;  %v661_v51 = vpop.xlane.xlu1 %660 }
 0x3aa   :  { %2201 = vrcp.f32 %v259_v37 }
 0x3af   :  { %v390_v38 = vpop.xlane.xlu0 %389 }
 0x3b0   :  { %v2202_v39 = vpop.eup %2201  ;;  %2203 = vrcp.f32 %v390_v38 }
 0x3b1   :  { %v393_v40 = vpop.xlane.xlu2 %392  ;;  %v263_v41 = vmul.f32 %v2202_v39, %v2188_v6  ;;  %v753_v6 = vld [vmem:[%s3107_s26 + $0x18] sm:$0xff] }
 0x3b2   :  { %2205 = vrcp.f32 %v393_v40  ;;  %776 = vmatpush.msra.mxu2 %v753_v6 }
 0x3b3   :  { %2020 = vmatmul.msk.f32.vlgmr.msrb.gmra.mxu3 %vm186_vm8, %v263_v41 }
 0x3b4   :  { %553 = vmatpush.msrb.mxu3 %v533_v42  ;;  %777 = vmatpush.msra.mxu2 %v752_v7 }
 0x3b6   :  { %v2204_v57 = vpop.eup %2203 }
 0x3b7   :  { %v396_v46 = vmul.f32 %v2204_v57, %v2192_v16  ;;  %v847_v57 = vld [vmem:[%s3050_s11 + $0x10] sm:$0xff] }
 0x3b8   :  { %v2206_v43 = vpop.eup %2205 }
 0x3b9   :  { %v397_v44 = vmul.f32 %v2206_v43, %v2194_v19  ;;  %v524_v45 = vpop.xlane.xlu2 %523  ;;  %v846_v43 = vld [vmem:[%s3050_s11 + $0x8] sm:$0xff] }
 0x3ba   :  { %2207 = vrcp.f32 %v524_v45 }
 0x3bb   :  { %2026 = vmatmul.msk.f32.vlgmr.msra.gmra.mxu1 %vm186_vm8, %v397_v44  ;;  %2025 = vmatmul.msk.f32.vlgmr.msra.gmra.mxu3 %vm186_vm8, %v396_v46  ;;  %2209 = vrcp.f32 %v527_v35  ;;  %v845_v44 = vld [vmem:[%s3050_s11] sm:$0xff] }
 0x3bc   :  { %687 = vmatpush.msra.mxu3 %v667_v36 }
 0x3c0   :  { %v2208_v48 = vpop.eup %2207 }
 0x3c1   :  { %v530_v49 = vmul.f32 %v2208_v48, %v2196_v21  ;;  %v2210_v53 = vpop.eup %2209 }
 0x3c2   :  { %v531_v56 = vmul.f32 %v2210_v53, %v2606_v1  ;;  %v693_v60 = vpop.permute.xlu0 %692 }
 0x3c3   :  { %2031 = vmatmul.msk.f32.vlgmr.msrb.gmra.mxu3 %vm186_vm8, %v530_v49 }
 0x3cd   :  { %v658_v50 = vpop.xlane.xlu2 %657 }
 0x3ce   :  { %2211 = vrcp.f32 %v658_v50 }
 0x3cf   :  { %2213 = vrcp.f32 %v661_v51 }
 0x3d4   :  { %v2212_v54 = vpop.eup %2211 }
 0x3d5   :  { %v664_v58 = vmul.f32 %v2212_v54, %v2198_v29  ;;  %v559_v59 = vpop.permute.xlu2 %558  ;;  %v2214_v61 = vpop.eup %2213 }
 0x3d6   :  { %579 = vmatpush.msrb.mxu1 %v559_v59  ;;  %v665_v62 = vmul.f32 %v2214_v61, %v2610_v8  ;;  %v751_v8 = vld [vmem:[%s3107_s26 + $0x8] sm:$0xff]  ;;  %v2160_v59 = vld [vmem:[%s3048_s9] ss:$0 sm:$0xff] }
 0x3d7   :  { %2032 = vmatmul.msk.f32.vlgmr.msrb.gmra.mxu1 %vm186_vm8, %v531_v56  ;;  %2037 = vmatmul.msk.f32.vlgmr.msra.gmra.mxu3 %vm186_vm8, %v664_v58 }
 0x3d8   :  { %713 = vmatpush.msra.mxu1 %v693_v60  ;;  %778 = vmatpush.msra.mxu2 %v751_v8 }
 0x3da   :  { %779 = vmatpush.msra.mxu2 %v750_v11 }
 0x3df   :  { %2038 = vmatmul.msk.f32.vlgmr.msra.gmra.mxu1 %vm186_vm8, %v665_v62 }
 0x3fe   :  { %v287_v63 = vpop.f32.mrf.mxu3 }
 0x436   :  { %v313_v0 = vpop.f32.mrf.mxu3 }
 0x438   :  { %v447_v55 = vpop.f32.mrf.mxu1 }
 0x43e   :  { %v421_v2 = vpop.f32.mrf.mxu3 }
 0x43f   :  { %720 = vrot.lane.b32.xlu0 %v421_v2, %s3078_s6 }
 0x446   :  { %v555_v1 = vpop.f32.mrf.mxu3 }
 0x447   :  { %728 = vrot.lane.b32.xlu0 %v555_v1, %s3088_s2 }
 0x44f   :  { %722 = vrot.lane.b32.xlu0 %v447_v55, %s3078_s6  ;;  %s3120_s6 = smov 16  }
 0x454   :  { %v581_v3 = vpop.f32.mrf.mxu1 }
 0x45a   :  { %v689_v4 = vpop.f32.mrf.mxu3 }
 0x45b   :  { %736 = vrot.lane.b32.xlu2 %v689_v4, %s3086_s29 }
 0x45c   :  { %v715_v5 = vpop.f32.mrf.mxu1 }
 0x45d   :  { %738 = vrot.lane.b32.xlu0 %v715_v5, %s3086_s29  ;;  %s3113_s29 = smov 104  }
 0x463   :  { %730 = vrot.lane.b32.xlu2 %v581_v3, %s3088_s2  ;;  %s3116_s2 = smov 48  }
 0x4b1   :  { %v721_v12 = vpop.permute.xlu0 %720 }
 0x4b2   :  { %v742_v13 = vsel %vm186_vm8, %v287_v63, %v721_v12 }
 0x4b5   :  { %v737_v16 = vpop.permute.xlu2 %736 }
 0x4b9   :  { %v729_v14 = vpop.permute.xlu0 %728 }
 0x4ba   :  { %v745_v17 = vsel %vm744_vm9, %v742_v13, %v729_v14  ;;  %v907_v14 = vld [vmem:[%s3052_s13 + $0x38] sm:$0xff] }
 0x4bb   :  { %v748_v18 = vsel %vm747_vm10, %v745_v17, %v737_v16  ;;  %927 = vmatpush.msrb.mxu3 %v907_v14  ;;  %v906_v16 = vld [vmem:[%s3052_s13 + $0x30] sm:$0xff]  ;;  %v905_v17 = vld [vmem:[%s3052_s13 + $0x28] sm:$0xff] }
 0x4bc   :  { %2039 = vmatmul.msk.f32.vlgmr.msra.gmra.mxu2 %vm82_vm0, %v748_v18  ;;  %v904_v18 = vld [vmem:[%s3052_s13 + $0x20] sm:$0xff] }
 0x4bd   :  { %v731_v21 = vpop.permute.xlu2 %730  ;;  %928 = vmatpush.msrb.mxu3 %v906_v16 }
 0x4bf   :  { %929 = vmatpush.msrb.mxu3 %v905_v17 }
 0x4c1   :  { %v723_v19 = vpop.permute.xlu0 %722  ;;  %930 = vmatpush.msrb.mxu3 %v904_v18  ;;  %v2164_v18 = vld [vmem:[%s3054_s15] ss:$0 sm:$0xff] }
 0x4c2   :  { %v743_v20 = vsel %vm186_vm8, %v313_v0, %v723_v19  ;;  %v2161_v0 = vld [vmem:[%s3049_s10] ss:$0 sm:$0xff]  ;;  %v903_v19 = vld [vmem:[%s3052_s13 + $0x18] sm:$0xff] }
 0x4c3   :  { %v746_v23 = vsel %vm744_vm9, %v743_v20, %v731_v21  ;;  %v902_v20 = vld [vmem:[%s3052_s13 + $0x10] sm:$0xff]  ;;  %931 = vmatpush.msrb.mxu3 %v903_v19  ;;  %v901_v21 = vld [vmem:[%s3052_s13 + $0x8] sm:$0xff] }
 0x4c5   :  { %932 = vmatpush.msrb.mxu3 %v902_v20 }
 0x4c7   :  { %933 = vmatpush.msrb.mxu3 %v901_v21 }
 0x4cf   :  { %v739_v22 = vpop.permute.xlu0 %738 }
 0x4d0   :  { %v749_v24 = vsel %vm747_vm10, %v746_v23, %v739_v22  ;;  %v900_v22 = vld [vmem:[%s3052_s13] sm:$0xff] }
 0x4d1   :  { %2040 = vmatmul.msk.f32.gmra.mxu2 %vm82_vm0, %v749_v24  ;;  %934 = vmatpush.msrb.mxu3 %v900_v22  ;;  %v2162_v23 = vld [vmem:[%s3051_s12] ss:$0 sm:$0xff] }
 0x53f   :  { %v781_v26 = vpop.f32.mrf.mxu2 }
 0x540   :  { %v782_v27 = vadd.f32 %v2159_v25, %v781_v26 }
 0x542   :  { %v787_v28 = vadd.f32 %v782_v27, %v2501_v47 }
 0x544   :  { %v791_v29 = vsel %vm82_vm0, %v787_v28, 0.0 }
 0x545   :  { %792 = vadd.xlane.f32.xlu1 %v791_v29 }
 0x554   :  { %v784_v30 = vpop.f32.mrf.mxu2 }
 0x555   :  { %v785_v31 = vadd.f32 %v2159_v25, %v784_v30 }
 0x557   :  { %v788_v32 = vadd.f32 %v785_v31, %v2505_v52  ;;  %v848_v52 = vld [vmem:[%s3050_s11 + $0x18] sm:$0xff] }
 0x558   :  { %871 = vmatpush.msrb.mxu0 %v848_v52 }
 0x559   :  { %v794_v33 = vsel %vm82_vm0, %v788_v32, 0.0 }
 0x55a   :  { %795 = vadd.xlane.f32.xlu2 %v794_v33  ;;  %872 = vmatpush.msrb.mxu0 %v847_v57 }
 0x55c   :  { %873 = vmatpush.msrb.mxu0 %v846_v43  ;;  %v2163_v43 = vld [vmem:[%s3053_s14] ss:$0 sm:$0xff] }
 0x55e   :  { %874 = vmatpush.msrb.mxu0 %v845_v44 }
 0x5b8   :  { %v793_v34 = vpop.xlane.xlu1 %792 }
 0x5b9   :  { %v797_v35 = vmul.f32 %v793_v34, %v2475_v10 }
 0x5bb   :  { %v799_v36 = vsub.f32 %v787_v28, %v797_v35 }
 0x5bd   :  { %v801_v37 = vmul.f32 %v799_v36, %v799_v36 }
 0x5bf   :  { %v803_v38 = vsel %vm82_vm0, %v801_v37, 0.0 }
 0x5c0   :  { %804 = vadd.xlane.f32.xlu0 %v803_v38 }
 0x5cd   :  { %v796_v39 = vpop.xlane.xlu2 %795 }
 0x5ce   :  { %v798_v47 = vmul.f32 %v796_v39, %v2475_v10 }
 0x5d0   :  { %v800_v40 = vsub.f32 %v788_v32, %v798_v47 }
 0x5d2   :  { %v802_v41 = vmul.f32 %v800_v40, %v800_v40 }
 0x5d4   :  { %v806_v42 = vsel %vm82_vm0, %v802_v41, 0.0 }
 0x5d5   :  { %807 = vadd.xlane.f32.xlu1 %v806_v42 }
 0x633   :  { %v805_v45 = vpop.xlane.xlu0 %804 }
 0x634   :  { %v809_v46 = vmul.f32 %v805_v45, %v2475_v10 }
 0x636   :  { %v811_v48 = vadd.f32 1e-12, %v809_v46 }
 0x638   :  { %2215 = vrsqrt.f32 %v811_v48  ;;  %vm819_vm12 = vweird.f32 %v811_v48 }
 0x63e   :  { %v2216_v49 = vpop.eup %2215 }
 0x63f   :  { %v814_v50 = vmul.f32 %v2216_v49, %v811_v48  ;;  %vm820_vm11 = vweird.f32 %v2216_v49 }
 0x640   :  { %vm821_vm13 = vmor %vm819_vm12, %vm820_vm11 }
 0x641   :  { %v815_v51 = vmul.f32 %v2216_v49, %v814_v50 }
 0x643   :  { %v816_v53 = vmul.f32 0.5, %v815_v51 }
 0x645   :  { %v817_v54 = vsub.f32 1.5, %v816_v53 }
 0x647   :  { %v818_v56 = vmul.f32 %v2216_v49, %v817_v54 }
 0x648   :  { %v808_v58 = vpop.xlane.xlu1 %807 }
 0x649   :  { %v810_v60 = vmul.f32 %v808_v58, %v2475_v10  ;;  %v822_v61 = vsel %vm821_vm13, %v2216_v49, %v818_v56 }
 0x64a   :  { %v833_v62 = vmul.f32 %v822_v61, %v799_v36 }
 0x64b   :  { %v812_v63 = vadd.f32 1e-12, %v810_v60 }
 0x64c   :  { %v838_v2 = vmul.f32 %v2160_v59, %v833_v62 }
 0x64d   :  { %2217 = vrsqrt.f32 %v812_v63  ;;  %vm829_vm15 = vweird.f32 %v812_v63 }
 0x64e   :  { %v2693_v1 = vadd.f32 %v2161_v0, %v838_v2 }
 0x650   :  { %2041 = vmatmul.msk.f32.vlgmr.msrb.gmra.mxu0 %vm82_vm0, %v2693_v1 }
 0x653   :  { %v2218_v55 = vpop.eup %2217 }
 0x654   :  { %v824_v3 = vmul.f32 %v2218_v55, %v812_v63  ;;  %vm830_vm14 = vweird.f32 %v2218_v55 }
 0x655   :  { %vm831_vm1 = vmor %vm829_vm15, %vm830_vm14 }
 0x656   :  { %v825_v4 = vmul.f32 %v2218_v55, %v824_v3  ;;  %v2046_v3 = vld [vmem:[%s3102_s0 + $0x28] sm:$0xff] }
 0x658   :  { %v826_v5 = vmul.f32 0.5, %v825_v4  ;;  %v2045_v4 = vld [vmem:[%s3102_s0 + $0x20] sm:$0xff] }
 0x65a   :  { %v827_v6 = vsub.f32 1.5, %v826_v5 }
 0x65c   :  { %v828_v7 = vmul.f32 %v2218_v55, %v827_v6 }
 0x65e   :  { %v832_v8 = vsel %vm831_vm1, %v2218_v55, %v828_v7  ;;  %v2047_v55 = vld [vmem:[%s3102_s0 + $0x30] sm:$0xff] }
 0x65f   :  { %v834_v11 = vmul.f32 %v832_v8, %v800_v40 }
 0x661   :  { %v839_v12 = vmul.f32 %v2160_v59, %v834_v11 }
 0x663   :  { %v844_v13 = vadd.f32 %v2161_v0, %v839_v12 }
 0x665   :  { %2042 = vmatmul.msk.f32.gmra.mxu0 %vm82_vm0, %v844_v13 }
 0x6cd   :  { %v876_v24 = vpop.f32.mrf.mxu0 }
 0x6ce   :  { %v877_v25 = vadd.f32 %v2162_v23, %v876_v24 }
 0x6d0   :  { %v884_v26 = vmul.f32 0.044715, %v877_v25  ;;  %v882_v32 = vmul.f32 0.5, %v877_v25 }
 0x6d2   :  { %v886_v27 = vmul.f32 %v884_v26, %v877_v25 }
 0x6d4   :  { %v888_v28 = vmul.f32 %v886_v27, %v877_v25 }
 0x6d6   :  { %v890_v29 = vadd.f32 %v888_v28, %v877_v25 }
 0x6d8   :  { %v892_v30 = vmul.f32 0.7978846, %v890_v29 }
 0x6da   :  { %2219 = vtanh.f32 %v892_v30 }
 0x6e0   :  { %v2220_v31 = vpop.eup %2219 }
 0x6e1   :  { %v896_v34 = vadd.f32 1.0, %v2220_v31 }
 0x6e2   :  { %v879_v33 = vpop.f32.mrf.mxu0 }
 0x6e3   :  { %v880_v35 = vadd.f32 %v2162_v23, %v879_v33  ;;  %v898_v36 = vmul.f32 %v896_v34, %v882_v32  ;;  %v2165_v23 = vld [vmem:[%s3055_s16] ss:$0 sm:$0xff] }
 0x6e5   :  { %v885_v37 = vmul.f32 0.044715, %v880_v35  ;;  %2043 = vmatmul.msk.f32.vlgmr.msrb.gmra.mxu3 %vm912_vm2, %v898_v36  ;;  %v883_v42 = vmul.f32 0.5, %v880_v35  ;;  %v2166_v36 = vld [vmem:[%s3105_s7 + $0x1] ss:$0 sm:$0xff]  ;;  %s3111_s7 = smov 72  }
 0x6e7   :  { %v887_v38 = vmul.f32 %v885_v37, %v880_v35 }
 0x6e9   :  { %v889_v39 = vmul.f32 %v887_v38, %v880_v35 }
 0x6eb   :  { %v891_v47 = vadd.f32 %v889_v39, %v880_v35 }
 0x6ed   :  { %v893_v40 = vmul.f32 0.7978846, %v891_v47 }
 0x6ef   :  { %2221 = vtanh.f32 %v893_v40 }
 0x6f5   :  { %v2222_v41 = vpop.eup %2221 }
 0x6f6   :  { %v897_v52 = vadd.f32 1.0, %v2222_v41 }
 0x6f8   :  { %v899_v57 = vmul.f32 %v897_v52, %v883_v42 }
 0x6fa   :  { %2044 = vmatmul.msk.f32.gmra.mxu3 %vm912_vm2, %v899_v57 }
 0x768   :  { %v936_v44 = vpop.f32.mrf.mxu3 }
 0x769   :  { %v937_v45 = vadd.f32 %v2163_v43, %v936_v44 }
 0x76b   :  { %v942_v46 = vadd.f32 %v937_v45, %v2693_v1  ;;  %v2048_v1 = vld [vmem:[%s3102_s0 + $0x38] sm:$0xff]  ;;  %s3118_s0 = smov 56  }
 0x76c   :  { %1028 = vmatpush.msrb.mxu1 %v2048_v1 }
 0x76d   :  { %v946_v48 = vsel %vm82_vm0, %v942_v46, 0.0 }
 0x76e   :  { %947 = vadd.xlane.f32.xlu1 %v946_v48  ;;  %1029 = vmatpush.msrb.mxu1 %v2047_v55 }
 0x770   :  { %1030 = vmatpush.msrb.mxu1 %v2046_v3 }
 0x772   :  { %1031 = vmatpush.msrb.mxu1 %v2045_v4 }
 0x77d   :  { %v939_v49 = vpop.f32.mrf.mxu3 }
 0x77e   :  { %v940_v50 = vadd.f32 %v2163_v43, %v939_v49 }
 0x780   :  { %v943_v51 = vadd.f32 %v940_v50, %v844_v13 }
 0x782   :  { %v949_v53 = vsel %vm82_vm0, %v943_v51, 0.0 }
 0x783   :  { %950 = vadd.xlane.f32.xlu1 %v949_v53 }
 0x7e1   :  { %v948_v54 = vpop.xlane.xlu1 %947 }
 0x7e2   :  { %v952_v56 = vmul.f32 %v948_v54, %v2475_v10 }
 0x7e4   :  { %v954_v58 = vsub.f32 %v942_v46, %v952_v56 }
 0x7e6   :  { %v956_v59 = vmul.f32 %v954_v58, %v954_v58 }
 0x7e8   :  { %v958_v60 = vsel %vm82_vm0, %v956_v59, 0.0 }
 0x7e9   :  { %959 = vadd.xlane.f32.xlu1 %v958_v60 }
 0x7f6   :  { %v951_v61 = vpop.xlane.xlu1 %950 }
 0x7f7   :  { %v953_v62 = vmul.f32 %v951_v61, %v2475_v10 }
 0x7f9   :  { %v955_v63 = vsub.f32 %v943_v51, %v953_v62 }
 0x7fb   :  { %v957_v0 = vmul.f32 %v955_v63, %v955_v63 }
 0x7fd   :  { %v961_v2 = vsel %vm82_vm0, %v957_v0, 0.0 }
 0x7fe   :  { %962 = vadd.xlane.f32.xlu1 %v961_v2 }
 0x85c   :  { %v960_v5 = vpop.xlane.xlu1 %959 }
 0x85d   :  { %v964_v6 = vmul.f32 %v960_v5, %v2475_v10 }
 0x85f   :  { %v966_v7 = vadd.f32 1e-12, %v964_v6 }
 0x861   :  { %2223 = vrsqrt.f32 %v966_v7  ;;  %vm974_vm4 = vweird.f32 %v966_v7 }
 0x867   :  { %v2224_v8 = vpop.eup %2223 }
 0x868   :  { %v969_v11 = vmul.f32 %v2224_v8, %v966_v7  ;;  %vm975_vm3 = vweird.f32 %v2224_v8 }
 0x869   :  { %vm976_vm5 = vmor %vm974_vm4, %vm975_vm3 }
 0x86a   :  { %v970_v12 = vmul.f32 %v2224_v8, %v969_v11 }
 0x86c   :  { %v971_v13 = vmul.f32 0.5, %v970_v12 }
 0x86e   :  { %v972_v14 = vsub.f32 1.5, %v971_v13 }
 0x870   :  { %v973_v16 = vmul.f32 %v2224_v8, %v972_v14 }
 0x871   :  { %v963_v17 = vpop.xlane.xlu1 %962 }
 0x872   :  { %v965_v19 = vmul.f32 %v963_v17, %v2475_v10  ;;  %v977_v20 = vsel %vm976_vm5, %v2224_v8, %v973_v16 }
 0x873   :  { %v988_v21 = vmul.f32 %v977_v20, %v954_v58 }
 0x874   :  { %v967_v22 = vadd.f32 1e-12, %v965_v19 }
 0x875   :  { %v993_v24 = vmul.f32 %v2164_v18, %v988_v21 }
 0x876   :  { %2225 = vrsqrt.f32 %v967_v22  ;;  %vm984_vm7 = vweird.f32 %v967_v22 }
 0x877   :  { %v2757_v25 = vadd.f32 %v2165_v23, %v993_v24 }
 0x879   :  { %2050 = vmatmul.msk.f32.vlgmr.msrb.gmra.mxu1 %vm82_vm0, %v2757_v25 }
 0x87c   :  { %v2226_v26 = vpop.eup %2225 }
 0x87d   :  { %v979_v27 = vmul.f32 %v2226_v26, %v967_v22  ;;  %vm985_vm6 = vweird.f32 %v2226_v26 }
 0x87e   :  { %vm986_vm11 = vmor %vm984_vm7, %vm985_vm6 }
 0x87f   :  { %v980_v28 = vmul.f32 %v2226_v26, %v979_v27 }
 0x881   :  { %v981_v29 = vmul.f32 0.5, %v980_v28 }
 0x883   :  { %v982_v30 = vsub.f32 1.5, %v981_v29 }
 0x885   :  { %v983_v31 = vmul.f32 %v2226_v26, %v982_v30 }
 0x887   :  { %v987_v32 = vsel %vm986_vm11, %v2226_v26, %v983_v31 }
 0x888   :  { %v989_v33 = vmul.f32 %v987_v32, %v955_v63 }
 0x88a   :  { %v994_v34 = vmul.f32 %v2164_v18, %v989_v33 }
 0x88c   :  { %v2761_v35 = vadd.f32 %v2165_v23, %v994_v34 }
 0x88e   :  { %2051 = vmatmul.msk.f32.gmra.mxu1 %vm82_vm0, %v2761_v35 }
 0x8f6   :  { %v1033_v37 = vpop.f32.mrf.mxu1 }
 0x8f7   :  { %v2768_v38 = vadd.f32 %v2166_v36, %v1033_v37 }
 0x8f9   :  { %1040 = vrot.lane.b32.xlu2 %v2768_v38, %s2326_s30 }
 0x901   :  { %1173 = vrot.lane.b32.xlu2 %v2768_v38, %s3109_s8 }
 0x90b   :  { %v1036_v39 = vpop.f32.mrf.mxu1 }
 0x90c   :  { %v2774_v47 = vadd.f32 %v2166_v36, %v1036_v39 }
 0x90e   :  { %1333 = vrot.lane.b32.xlu2 %v2774_v47, %s3110_s1  ;;  %1201 = vrot.lane.b32.xlu1 %v2774_v47, %s3109_s8  ;;  %v2136_v27 = vpack.i.bf16 %v2774_v47, %v2768_v38 }
 0x90f   :  { %1067 = vrot.lane.b32.xlu0 %v2774_v47, %s2326_s30  ;;  %s3115_s30 = smov 64  }
 0x916   :  { %1469 = vrot.lane.b32.xlu2 %v2774_v47, %s3111_s7  ;;  %1171 = vrot.lane.b32.xlu1 %v2768_v38, %s3112_s5 }
 0x917   :  { %1199 = vrot.lane.b32.xlu0 %v2774_v47, %s3112_s5  ;;  %s1999_s5 = sshll.u32 %s3063_s24, 4  ;;  %s2000_s5 = int_to_ptr.hbm [resolvable:$true] %s1999_s5 }
 0x91e   :  { %1439 = vrot.lane.b32.xlu2 %v2768_v38, %s3113_s29  ;;  %1307 = vrot.lane.b32.xlu1 %v2768_v38, %s3114_s25 }
 0x91f   :  { %1335 = vrot.lane.b32.xlu0 %v2774_v47, %s3114_s25 }
 0x926   :  { %1467 = vrot.lane.b32.xlu1 %v2774_v47, %s3113_s29 }
 0x927   :  { %1305 = vrot.lane.b32.xlu0 %v2768_v38, %s3110_s1  ;;  %s2341_s1 = smov [#allocation4]  }
 0x92f   :  { %1441 = vrot.lane.b32.xlu0 %v2768_v38, %s3111_s7  ;;  %s1997_s7 = sshll.u32 %s2341_s1, 4  ;;  %s1998_s7 = int_to_ptr.vmem [resolvable:$true] %s1997_s7 }
 0x953   :  { %v1041_v40 = vpop.permute.xlu2 %1040 }
 0x954   :  { %2052 = vmatpush.xpose.msk.msrb.mxu2 %vm186_vm8, %v1041_v40 }
 0x957   :  { %2053 = vmatmul.msk.f32.vlgmr.msrb.gmra.mxu2 %vm186_vm8, %v2768_v38 }
 0x95b   :  { %v1174_v41 = vpop.permute.xlu2 %1173 }
 0x968   :  { %v1334_v57 = vpop.permute.xlu2 %1333 }
 0x970   :  { %v1470_v48 = vpop.permute.xlu2 %1469 }
 0x978   :  { %v1440_v53 = vpop.permute.xlu2 %1439 }
 0x980   :  { %v1202_v42 = vpop.permute.xlu1 %1201 }
 0x981   :  { %v1068_v52 = vpop.permute.xlu0 %1067  ;;  %2060 = vmatpush.xpose.msk.msra.mxu3 %vm186_vm8, %v1202_v42 }
 0x982   :  { %2054 = vmatpush.xpose.msk.msra.mxu0 %vm186_vm8, %v1068_v52 }
 0x985   :  { %2055 = vmatmul.msk.f32.vlgmr.msra.gmra.mxu0 %vm186_vm8, %v2774_v47 }
 0x986   :  { %2058 = vmatpush.xpose.msk.msrb.mxu0 %vm186_vm8, %v1174_v41 }
 0x988   :  { %v1172_v43 = vpop.permute.xlu1 %1171 }
 0x989   :  { %v1200_v44 = vpop.permute.xlu0 %1199 }
 0x98a   :  { %2061 = vmatmul.msk.f32.vlgmr.msra.gmra.mxu3 %vm186_vm8, %v1200_v44 }
 0x98d   :  { %2059 = vmatmul.msk.f32.vlgmr.msrb.gmra.mxu0 %vm186_vm8, %v1172_v43 }
 0x990   :  { %v1308_v45 = vpop.permute.xlu1 %1307 }
 0x991   :  { %v1336_v46 = vpop.permute.xlu0 %1335  ;;  %2064 = vmatpush.xpose.msk.msra.mxu0 %vm186_vm8, %v1308_v45 }
 0x992   :  { %2066 = vmatpush.xpose.msk.msrb.mxu3 %vm186_vm8, %v1336_v46 }
 0x995   :  { %2067 = vmatmul.msk.f32.vlgmr.msrb.gmra.mxu3 %vm186_vm8, %v1334_v57 }
 0x996   :  { %2072 = vmatpush.xpose.msk.msra.mxu3 %vm186_vm8, %v1470_v48 }
 0x998   :  { %v1468_v50 = vpop.permute.xlu1 %1467 }
 0x999   :  { %v1306_v49 = vpop.permute.xlu0 %1305 }
 0x99a   :  { %2065 = vmatmul.msk.f32.vlgmr.msra.gmra.mxu0 %vm186_vm8, %v1306_v49 }
 0x99d   :  { %2073 = vmatmul.msk.f32.vlgmr.msra.gmra.mxu3 %vm186_vm8, %v1468_v50 }
 0x9a1   :  { %v1442_v51 = vpop.permute.xlu0 %1441 }
 0x9a2   :  { %2070 = vmatpush.xpose.msk.msrb.mxu0 %vm186_vm8, %v1442_v51 }
 0x9a5   :  { %2071 = vmatmul.msk.f32.vlgmr.msrb.gmra.mxu0 %vm186_vm8, %v1440_v53 }
 0x9da   :  { %v1063_v54 = vpop.f32.mrf.mxu2 }
 0x9db   :  { %v1093_v56 = vmul.f32 0.35355338, %v1063_v54 }
 0x9dd   :  { %v1095_v58 = vadd.f32 %v1093_v56, %v2565_v9 }
 0x9df   :  { %v1097_v59 = vsel %vm186_vm8, %v1095_v58, -inf }
 0x9e0   :  { %1098 = vmax.xlane.f32.xlu1 %v1097_v59 }
 0xa02   :  { %v1090_v60 = vpop.f32.mrf.mxu0 }
 0xa03   :  { %v1094_v61 = vmul.f32 0.35355338, %v1090_v60 }
 0xa05   :  { %v1096_v62 = vadd.f32 %v1094_v61, %v2572_v15 }
 0xa07   :  { %v1100_v63 = vsel %vm186_vm8, %v1096_v62, -inf }
 0xa08   :  { %1101 = vmax.xlane.f32.xlu0 %v1100_v63 }
 0xa0a   :  { %v1196_v0 = vpop.f32.mrf.mxu0 }
 0xa0b   :  { %v1227_v2 = vmul.f32 0.35355338, %v1196_v0 }
 0xa0d   :  { %v1224_v1 = vpop.f32.mrf.mxu3  ;;  %v1229_v55 = vadd.f32 %v1227_v2, %v2565_v9 }
 0xa0e   :  { %v1228_v3 = vmul.f32 0.35355338, %v1224_v1 }
 0xa0f   :  { %v1231_v4 = vsel %vm186_vm8, %v1229_v55, -inf }
 0xa10   :  { %1232 = vmax.xlane.f32.xlu2 %v1231_v4  ;;  %v1230_v5 = vadd.f32 %v1228_v3, %v2572_v15 }
 0xa12   :  { %v1234_v6 = vsel %vm186_vm8, %v1230_v5, -inf }
 0xa13   :  { %1235 = vmax.xlane.f32.xlu1 %v1234_v6 }
 0xa17   :  { %v1330_v7 = vpop.f32.mrf.mxu0 }
 0xa18   :  { %v1361_v8 = vmul.f32 0.35355338, %v1330_v7  ;;  %v1358_v11 = vpop.f32.mrf.mxu3 }
 0xa19   :  { %v1362_v12 = vmul.f32 0.35355338, %v1358_v11 }
 0xa1a   :  { %v1363_v13 = vadd.f32 %v1361_v8, %v2565_v9 }
 0xa1b   :  { %v1364_v14 = vadd.f32 %v1362_v12, %v2572_v15 }
 0xa1c   :  { %v1365_v16 = vsel %vm186_vm8, %v1363_v13, -inf }
 0xa1d   :  { %1366 = vmax.xlane.f32.xlu0 %v1365_v16  ;;  %v1368_v17 = vsel %vm186_vm8, %v1364_v14, -inf }
 0xa1e   :  { %1369 = vmax.xlane.f32.xlu2 %v1368_v17 }
 0xa20   :  { %v1492_v18 = vpop.f32.mrf.mxu3 }
 0xa21   :  { %v1496_v19 = vmul.f32 0.35355338, %v1492_v18 }
 0xa22   :  { %v1464_v20 = vpop.f32.mrf.mxu0 }
 0xa23   :  { %v1495_v21 = vmul.f32 0.35355338, %v1464_v20  ;;  %v2831_v22 = vadd.f32 %v1496_v19, %v2572_v15 }
 0xa25   :  { %v1502_v23 = vsel %vm186_vm8, %v2831_v22, -inf  ;;  %v1497_v24 = vadd.f32 %v1495_v21, %v2565_v9 }
 0xa26   :  { %1503 = vmax.xlane.f32.xlu0 %v1502_v23 }
 0xa27   :  { %v1499_v26 = vsel %vm186_vm8, %v1497_v24, -inf }
 0xa28   :  { %1500 = vmax.xlane.f32.xlu1 %v1499_v26 }
 0xa36   :  { %2137 = vrot.lane.b32.xlu2 %v2136_v27, %s3115_s30 }
 0xa53   :  { %v1099_v28 = vpop.xlane.xlu1 %1098 }
 0xa54   :  { %v1103_v29 = vsub.f32 %v1095_v58, %v1099_v28 }
 0xa56   :  { %v1105_v30 = vmul.f32 1.442695, %v1103_v29 }
 0xa58   :  { %2227 = vpow2.f32 %v1105_v30 }
 0xa5e   :  { %v2840_v15 = vpop.eup %2227 }
 0xa5f   :  { %v1109_v31 = vsel %vm186_vm8, %v2840_v15, 0.0 }
 0xa60   :  { %1110 = vadd.xlane.f32.xlu2 %v1109_v31 }
 0xa78   :  { %2147 = vrot.lane.b32.xlu2 %v2136_v27, %s3116_s2 }
 0xa7b   :  { %v1102_v9 = vpop.xlane.xlu0 %1101 }
 0xa7c   :  { %v1104_v32 = vsub.f32 %v1096_v62, %v1102_v9 }
 0xa7e   :  { %v1107_v33 = vmul.f32 1.442695, %v1104_v32 }
 0xa80   :  { %2229 = vpow2.f32 %v1107_v33  ;;  %2152 = vrot.lane.b32.xlu2 %v2136_v27, %s3117_s27  ;;  %s3122_s27 = sld [smem:[#allocation10_spill]] }
 0xa83   :  { %v1233_v34 = vpop.xlane.xlu2 %1232 }
 0xa84   :  { %v1237_v36 = vsub.f32 %v1229_v55, %v1233_v34 }
 0xa86   :  { %v2230_v37 = vpop.eup %2229  ;;  %v1239_v38 = vmul.f32 1.442695, %v1237_v36  ;;  %v1236_v39 = vpop.xlane.xlu1 %1235 }
 0xa87   :  { %v1238_v47 = vsub.f32 %v1230_v5, %v1236_v39  ;;  %v1112_v40 = vsel %vm186_vm8, %v2230_v37, 0.0 }
 0xa88   :  { %2231 = vpow2.f32 %v1239_v38  ;;  %1113 = vadd.xlane.f32.xlu1 %v1112_v40 }
 0xa89   :  { %v1241_v41 = vmul.f32 1.442695, %v1238_v47 }
 0xa8b   :  { %2233 = vpow2.f32 %v1241_v41 }
 0xa8e   :  { %v2847_v42 = vpop.eup %2231 }
 0xa8f   :  { %v1243_v52 = vsel %vm186_vm8, %v2847_v42, 0.0 }
 0xa90   :  { %1244 = vadd.xlane.f32.xlu0 %v1243_v52  ;;  %v1367_v43 = vpop.xlane.xlu0 %1366 }
 0xa91   :  { %v2851_v57 = vpop.eup %2233  ;;  %v1370_v44 = vpop.xlane.xlu2 %1369  ;;  %v1371_v48 = vsub.f32 %v1363_v13, %v1367_v43 }
 0xa92   :  { %v1372_v45 = vsub.f32 %v1364_v14, %v1370_v44  ;;  %v1246_v46 = vsel %vm186_vm8, %v2851_v57, 0.0 }
 0xa93   :  { %1247 = vadd.xlane.f32.xlu1 %v1246_v46  ;;  %v1373_v50 = vmul.f32 1.442695, %v1371_v48  ;;  %v2079_v48 = vld [vmem:[%s3107_s26 + $0x38] sm:$0xff] }
 0xa94   :  { %v1375_v49 = vmul.f32 1.442695, %v1372_v45  ;;  %1631 = vmatpush.msra.mxu0 %v2079_v48 }
 0xa96   :  { %2235 = vpow2.f32 %v1375_v49  ;;  %v2078_v49 = vld [vmem:[%s3107_s26 + $0x30] sm:$0xff] }
 0xa97   :  { %2237 = vpow2.f32 %v1373_v50  ;;  %v2077_v50 = vld [vmem:[%s3107_s26 + $0x28] sm:$0xff]  ;;  %1632 = vmatpush.msra.mxu0 %v2078_v49 }
 0xa99   :  { %v2138_v51 = vpop.permute.xlu2 %2137  ;;  %v1504_v62 = vpop.xlane.xlu0 %1503  ;;  %1633 = vmatpush.msra.mxu0 %v2077_v50 }
 0xa9a   :  { %v2140_v53 = vunpack.i.h.bf16 %v2138_v51  ;;  %v2139_v54 = vunpack.i.l.bf16 %v2138_v51  ;;  %v1506_v0 = vsub.f32 %v2831_v22, %v1504_v62  ;;  %v2076_v51 = vld [vmem:[%s3107_s26 + $0x20] sm:$0xff] }
 0xa9b   :  { %v1501_v56 = vpop.xlane.xlu1 %1500  ;;  %1634 = vmatpush.msra.mxu0 %v2076_v51 }
 0xa9c   :  { %v2855_v58 = vpop.eup %2235  ;;  %v1505_v59 = vsub.f32 %v1497_v24, %v1501_v56  ;;  %1140 = vmatpush.msra.mxu1 %v2139_v54  ;;  %1166 = vmatpush.msra.mxu2 %v2140_v53  ;;  %v1509_v1 = vmul.f32 1.442695, %v1506_v0 }
 0xa9d   :  { %v1380_v60 = vsel %vm186_vm8, %v2855_v58, 0.0  ;;  %v2238_v63 = vpop.eup %2237 }
 0xa9e   :  { %1381 = vadd.xlane.f32.xlu0 %v1380_v60  ;;  %v1507_v61 = vmul.f32 1.442695, %v1505_v59  ;;  %v1377_v2 = vsel %vm186_vm8, %v2238_v63, 0.0 }
 0xaa0   :  { %2239 = vpow2.f32 %v1507_v61 }
 0xaa1   :  { %2241 = vpow2.f32 %v1509_v1 }
 0xaa6   :  { %1378 = vadd.xlane.f32.xlu0 %v1377_v2  ;;  %v2240_v55 = vpop.eup %2239 }
 0xaa7   :  { %v1511_v3 = vsel %vm186_vm8, %v2240_v55, 0.0  ;;  %v2242_v4 = vpop.eup %2241 }
 0xaa8   :  { %v1514_v5 = vsel %vm186_vm8, %v2242_v4, 0.0 }
 0xaac   :  { %2142 = vrot.lane.b32.xlu1 %v2136_v27, %s3118_s0 }
 0xaae   :  { %1512 = vadd.xlane.f32.xlu0 %v1511_v3 }
 0xab6   :  { %1515 = vadd.xlane.f32.xlu0 %v1514_v5 }
 0xad3   :  { %v1111_v6 = vpop.xlane.xlu2 %1110 }
 0xad4   :  { %2243 = vrcp.f32 %v1111_v6 }
 0xada   :  { %v2244_v7 = vpop.eup %2243 }
 0xadb   :  { %v1117_v8 = vmul.f32 %v2244_v7, %v2840_v15  ;;  %v2148_v18 = vpop.permute.xlu2 %2147 }
 0xadc   :  { %v2150_v29 = vunpack.i.h.bf16 %v2148_v18  ;;  %v2149_v30 = vunpack.i.l.bf16 %v2148_v18 }
 0xadd   :  { %2056 = vmatmul.msk.f32.vlgmr.msra.gmra.mxu1 %vm186_vm8, %v1117_v8 }
 0xae3   :  { %v2153_v23 = vpop.permute.xlu2 %2152 }
 0xae4   :  { %v2155_v31 = vunpack.i.h.bf16 %v2153_v23  ;;  %v2154_v9 = vunpack.i.l.bf16 %v2153_v23  ;;  %v2087_v23 = vld [vmem:[%s3050_s11 + $0x30] sm:$0xff] }
 0xafb   :  { %v1114_v11 = vpop.xlane.xlu1 %1113 }
 0xafc   :  { %2245 = vrcp.f32 %v1114_v11 }
 0xb02   :  { %v2246_v12 = vpop.eup %2245 }
 0xb03   :  { %v1118_v13 = vmul.f32 %v2246_v12, %v2230_v37  ;;  %v1245_v14 = vpop.xlane.xlu0 %1244 }
 0xb04   :  { %2247 = vrcp.f32 %v1245_v14 }
 0xb05   :  { %2057 = vmatmul.msk.f32.vlgmr.msra.gmra.mxu2 %vm186_vm8, %v1118_v13 }
 0xb06   :  { %v1248_v17 = vpop.xlane.xlu1 %1247 }
 0xb07   :  { %2249 = vrcp.f32 %v1248_v17 }
 0xb0a   :  { %v2248_v20 = vpop.eup %2247 }
 0xb0b   :  { %v1251_v27 = vmul.f32 %v2248_v20, %v2847_v42 }
 0xb0d   :  { %v2250_v21 = vpop.eup %2249 }
 0xb0e   :  { %v1252_v28 = vmul.f32 %v2250_v21, %v2851_v57 }
 0xb11   :  { %v1382_v16 = vpop.xlane.xlu0 %1381 }
 0xb12   :  { %2251 = vrcp.f32 %v1382_v16 }
 0xb18   :  { %v2252_v32 = vpop.eup %2251 }
 0xb19   :  { %v1379_v19 = vpop.xlane.xlu0 %1378  ;;  %v1386_v34 = vmul.f32 %v2252_v32, %v2855_v58 }
 0xb1a   :  { %2253 = vrcp.f32 %v1379_v19 }
 0xb1e   :  { %v2143_v22 = vpop.permute.xlu1 %2142 }
 0xb1f   :  { %v2145_v24 = vunpack.i.h.bf16 %v2143_v22  ;;  %v2144_v26 = vunpack.i.l.bf16 %v2143_v22 }
 0xb20   :  { %v2254_v33 = vpop.eup %2253 }
 0xb21   :  { %1274 = vmatpush.msrb.mxu1 %v2144_v26  ;;  %1300 = vmatpush.msrb.mxu2 %v2145_v24  ;;  %v1513_v15 = vpop.xlane.xlu0 %1512  ;;  %v1385_v36 = vmul.f32 %v2254_v33, %v2238_v63  ;;  %v2086_v24 = vld [vmem:[%s3050_s11 + $0x28] sm:$0xff]  ;;  %v2085_v26 = vld [vmem:[%s3050_s11 + $0x20] sm:$0xff] }
 0xb22   :  { %2062 = vmatmul.msk.f32.vlgmr.msrb.gmra.mxu1 %vm186_vm8, %v1251_v27  ;;  %2063 = vmatmul.msk.f32.vlgmr.msrb.gmra.mxu2 %vm186_vm8, %v1252_v28  ;;  %2255 = vrcp.f32 %v1513_v15 }
 0xb23   :  { %1408 = vmatpush.msra.mxu1 %v2149_v30  ;;  %1434 = vmatpush.msra.mxu2 %v2150_v29 }
 0xb25   :  { %1542 = vmatpush.msrb.mxu1 %v2154_v9  ;;  %1568 = vmatpush.msrb.mxu2 %v2155_v31 }
 0xb28   :  { %v2256_v38 = vpop.eup %2255 }
 0xb29   :  { %v1516_v37 = vpop.xlane.xlu0 %1515  ;;  %v1519_v47 = vmul.f32 %v2256_v38, %v2240_v55  ;;  %v2167_v55 = vld [vmem:[%s3108_s4 + $0x1] ss:$0 sm:$0xff] }
 0xb2a   :  { %2257 = vrcp.f32 %v1516_v37  ;;  %2068 = vmatmul.msk.f32.vlgmr.msra.gmra.mxu1 %vm186_vm8, %v1385_v36  ;;  %2069 = vmatmul.msk.f32.vlgmr.msra.gmra.mxu2 %vm186_vm8, %v1386_v34  ;;  %v2168_v38 = vld [vmem:[%s3048_s9 + $0x1] ss:$0 sm:$0xff] }
 0xb30   :  { %v2258_v39 = vpop.eup %2257 }
 0xb31   :  { %v1520_v40 = vmul.f32 %v2258_v39, %v2242_v4 }
 0xb32   :  { %2074 = vmatmul.msk.f32.vlgmr.msrb.gmra.mxu1 %vm186_vm8, %v1519_v47 }
 0xb33   :  { %2075 = vmatmul.msk.f32.vlgmr.msrb.gmra.mxu2 %vm186_vm8, %v1520_v40  ;;  %v2169_v40 = vld [vmem:[%s3049_s10 + $0x1] ss:$0 sm:$0xff] }
 0xb5a   :  { %v1142_v41 = vpop.f32.mrf.mxu1 }
 0xb88   :  { %v1168_v42 = vpop.f32.mrf.mxu2 }
 0xb9f   :  { %v1276_v52 = vpop.f32.mrf.mxu1 }
 0xba0   :  { %1575 = vrot.lane.b32.xlu0 %v1276_v52, %s3119_s28 }
 0xba5   :  { %v1302_v57 = vpop.f32.mrf.mxu2 }
 0xba7   :  { %v1410_v43 = vpop.f32.mrf.mxu1 }
 0xba8   :  { %1583 = vrot.lane.b32.xlu1 %v1410_v43, %s3120_s6 }
 0xbad   :  { %v1436_v44 = vpop.f32.mrf.mxu2 }
 0xbaf   :  { %v1544_v45 = vpop.f32.mrf.mxu1 }
 0xbb0   :  { %1577 = vrot.lane.b32.xlu1 %v1302_v57, %s3119_s28  ;;  %1591 = vrot.lane.b32.xlu2 %v1544_v45, %s3121_s3  ;;  %s2340_s28 = smov [#allocation2]  }
 0xbb6   :  { %v1570_v46 = vpop.f32.mrf.mxu2 }
 0xbb8   :  { %1585 = vrot.lane.b32.xlu2 %v1436_v44, %s3120_s6  ;;  %1593 = vrot.lane.b32.xlu1 %v1570_v46, %s3121_s3  ;;  %s1988_s3 = sshll.u32 %s3062_s23, 4  ;;  %s1989_s3 = int_to_ptr.hbm [resolvable:$true] %s1988_s3 }
 0xc0a   :  { %v1592_v58 = vpop.permute.xlu2 %1591 }
 0xc12   :  { %v1576_v53 = vpop.permute.xlu0 %1575  ;;  %v1586_v63 = vpop.permute.xlu2 %1585 }
 0xc13   :  { %v1597_v54 = vsel %vm186_vm8, %v1142_v41, %v1576_v53  ;;  %v2099_v53 = vld [vmem:[%s3052_s13 + $0x78] sm:$0xff] }
 0xc14   :  { %1787 = vmatpush.msra.mxu1 %v2099_v53 }
 0xc1a   :  { %v1584_v56 = vpop.permute.xlu1 %1583 }
 0xc1b   :  { %v1599_v59 = vsel %vm744_vm9, %v1597_v54, %v1584_v56  ;;  %v2098_v54 = vld [vmem:[%s3052_s13 + $0x70] sm:$0xff]  ;;  %v2097_v56 = vld [vmem:[%s3052_s13 + $0x68] sm:$0xff] }
 0xc1c   :  { %v1601_v60 = vsel %vm747_vm10, %v1599_v59, %v1592_v58  ;;  %1788 = vmatpush.msra.mxu1 %v2098_v54  ;;  %v2096_v58 = vld [vmem:[%s3052_s13 + $0x60] sm:$0xff]  ;;  %v2095_v59 = vld [vmem:[%s3052_s13 + $0x58] sm:$0xff] }
 0xc1d   :  { %2081 = vmatmul.msk.f32.vlgmr.msra.gmra.mxu0 %vm82_vm0, %v1601_v60  ;;  %v2094_v60 = vld [vmem:[%s3052_s13 + $0x50] sm:$0xff] }
 0xc1e   :  { %1789 = vmatpush.msra.mxu1 %v2097_v56 }
 0xc20   :  { %1790 = vmatpush.msra.mxu1 %v2096_v58 }
 0xc22   :  { %v1578_v61 = vpop.permute.xlu1 %1577  ;;  %1791 = vmatpush.msra.mxu1 %v2095_v59 }
 0xc23   :  { %v1598_v62 = vsel %vm186_vm8, %v1168_v42, %v1578_v61  ;;  %v2093_v61 = vld [vmem:[%s3052_s13 + $0x48] sm:$0xff] }
 0xc24   :  { %v1600_v2 = vsel %vm744_vm9, %v1598_v62, %v1586_v63  ;;  %1792 = vmatpush.msra.mxu1 %v2094_v60  ;;  %v2092_v62 = vld [vmem:[%s3052_s13 + $0x40] sm:$0xff] }
 0xc25   :  { %v2170_v63 = vld [vmem:[%s3051_s12 + $0x1] ss:$0 sm:$0xff] }
 0xc26   :  { %1793 = vmatpush.msra.mxu1 %v2093_v61 }
 0xc28   :  { %1794 = vmatpush.msra.mxu1 %v2092_v62 }
 0xc2a   :  { %v1594_v0 = vpop.permute.xlu1 %1593 }
 0xc2b   :  { %v1602_v1 = vsel %vm747_vm10, %v1600_v2, %v1594_v0 }
 0xc2c   :  { %2082 = vmatmul.msk.f32.gmra.mxu0 %vm82_vm0, %v1602_v1 }
 0xc9a   :  { %v1636_v3 = vpop.f32.mrf.mxu0 }
 0xc9b   :  { %v1637_v4 = vadd.f32 %v2167_v55, %v1636_v3 }
 0xc9d   :  { %v1642_v5 = vadd.f32 %v1637_v4, %v2757_v25 }
 0xc9f   :  { %v1648_v6 = vsel %vm82_vm0, %v1642_v5, 0.0 }
 0xca0   :  { %1649 = vadd.xlane.f32.xlu2 %v1648_v6 }
 0xca9   :  { %v1639_v7 = vpop.f32.mrf.mxu0 }
 0xcaa   :  { %v1640_v8 = vadd.f32 %v2167_v55, %v1639_v7 }
 0xcac   :  { %v1643_v11 = vadd.f32 %v1640_v8, %v2761_v35  ;;  %v2088_v35 = vld [vmem:[%s3050_s11 + $0x38] sm:$0xff] }
 0xcad   :  { %1730 = vmatpush.msrb.mxu3 %v2088_v35  ;;  %v2171_v35 = vld [vmem:[%s3053_s14 + $0x1] ss:$0 sm:$0xff] }
 0xcae   :  { %v1651_v12 = vsel %vm82_vm0, %v1643_v11, 0.0 }
 0xcaf   :  { %1652 = vadd.xlane.f32.xlu0 %v1651_v12  ;;  %1731 = vmatpush.msrb.mxu3 %v2087_v23 }
 0xcb1   :  { %1732 = vmatpush.msrb.mxu3 %v2086_v24 }
 0xcb3   :  { %1733 = vmatpush.msrb.mxu3 %v2085_v26 }
 0xd13   :  { %v1650_v13 = vpop.xlane.xlu2 %1649 }
 0xd14   :  { %v1654_v14 = vmul.f32 %v1650_v13, %v2475_v10 }
 0xd16   :  { %v1656_v16 = vsub.f32 %v1642_v5, %v1654_v14 }
 0xd18   :  { %v1658_v17 = vmul.f32 %v1656_v16, %v1656_v16 }
 0xd1a   :  { %v1660_v18 = vsel %vm82_vm0, %v1658_v17, 0.0 }
 0xd1b   :  { %1661 = vadd.xlane.f32.xlu1 %v1660_v18 }
 0xd22   :  { %v1653_v19 = vpop.xlane.xlu0 %1652 }
 0xd23   :  { %v1655_v25 = vmul.f32 %v1653_v19, %v2475_v10 }
 0xd25   :  { %v1657_v20 = vsub.f32 %v1643_v11, %v1655_v25 }
 0xd27   :  { %v1659_v21 = vmul.f32 %v1657_v20, %v1657_v20 }
 0xd29   :  { %v1663_v22 = vsel %vm82_vm0, %v1659_v21, 0.0 }
 0xd2a   :  { %1664 = vadd.xlane.f32.xlu2 %v1663_v22 }
 0xd8e   :  { %v1662_v27 = vpop.xlane.xlu1 %1661 }
 0xd8f   :  { %v1666_v28 = vmul.f32 %v1662_v27, %v2475_v10 }
 0xd91   :  { %v1668_v29 = vadd.f32 1e-12, %v1666_v28 }
 0xd93   :  { %2259 = vrsqrt.f32 %v1668_v29  ;;  %vm1676_vm10 = vweird.f32 %v1668_v29 }
 0xd99   :  { %v2260_v30 = vpop.eup %2259 }
 0xd9a   :  { %v1671_v15 = vmul.f32 %v2260_v30, %v1668_v29  ;;  %vm1677_vm8 = vweird.f32 %v2260_v30 }
 0xd9b   :  { %vm1678_vm12 = vmor %vm1676_vm10, %vm1677_vm8 }
 0xd9c   :  { %v1672_v31 = vmul.f32 %v2260_v30, %v1671_v15 }
 0xd9d   :  { %v1665_v9 = vpop.xlane.xlu2 %1664 }
 0xd9e   :  { %v1673_v32 = vmul.f32 0.5, %v1672_v31  ;;  %v1667_v33 = vmul.f32 %v1665_v9, %v2475_v10 }
 0xda0   :  { %v1674_v34 = vsub.f32 1.5, %v1673_v32  ;;  %v1669_v36 = vadd.f32 1e-12, %v1667_v33 }
 0xda2   :  { %v1675_v37 = vmul.f32 %v2260_v30, %v1674_v34  ;;  %2261 = vrsqrt.f32 %v1669_v36  ;;  %vm1686_vm14 = vweird.f32 %v1669_v36 }
 0xda4   :  { %v1679_v39 = vsel %vm1678_vm12, %v2260_v30, %v1675_v37 }
 0xda5   :  { %v1690_v47 = vmul.f32 %v1679_v39, %v1656_v16 }
 0xda7   :  { %v1695_v41 = vmul.f32 %v2168_v38, %v1690_v47 }
 0xda8   :  { %v2262_v42 = vpop.eup %2261 }
 0xda9   :  { %v1681_v52 = vmul.f32 %v2262_v42, %v1669_v36  ;;  %v1700_v57 = vadd.f32 %v2169_v40, %v1695_v41  ;;  %vm1687_vm13 = vweird.f32 %v2262_v42 }
 0xdaa   :  { %vm1688_vm15 = vmor %vm1686_vm14, %vm1687_vm13 }
 0xdab   :  { %v1682_v43 = vmul.f32 %v2262_v42, %v1681_v52  ;;  %2090 = vmatmul.msk.f32.vlgmr.msrb.gmra.mxu3 %vm82_vm0, %v1700_v57 }
 0xdad   :  { %v1683_v44 = vmul.f32 0.5, %v1682_v43 }
 0xdaf   :  { %v1684_v45 = vsub.f32 1.5, %v1683_v44 }
 0xdb1   :  { %v1685_v46 = vmul.f32 %v2262_v42, %v1684_v45 }
 0xdb3   :  { %v1689_v48 = vsel %vm1688_vm15, %v2262_v42, %v1685_v46 }
 0xdb4   :  { %v1691_v49 = vmul.f32 %v1689_v48, %v1657_v20 }
 0xdb6   :  { %v1696_v50 = vmul.f32 %v2168_v38, %v1691_v49 }
 0xdb8   :  { %v1701_v51 = vadd.f32 %v2169_v40, %v1696_v50 }
 0xdba   :  { %2091 = vmatmul.msk.f32.gmra.mxu3 %vm82_vm0, %v1701_v51 }
 0xe2e   :  { %v1735_v0 = vpop.f32.mrf.mxu3 }
 0xe2f   :  { %v1736_v2 = vadd.f32 %v2170_v63, %v1735_v0 }
 0xe31   :  { %v1743_v1 = vmul.f32 0.044715, %v1736_v2  ;;  %v1741_v12 = vmul.f32 0.5, %v1736_v2 }
 0xe33   :  { %v1745_v55 = vmul.f32 %v1743_v1, %v1736_v2 }
 0xe35   :  { %v1747_v3 = vmul.f32 %v1745_v55, %v1736_v2 }
 0xe37   :  { %v1749_v4 = vadd.f32 %v1747_v3, %v1736_v2  ;;  %v2173_v2 = vld [vmem:[%s3055_s16 + $0x1] ss:$0 sm:$0xff] }
 0xe39   :  { %v1751_v5 = vmul.f32 0.7978846, %v1749_v4  ;;  %v1862_v4 = vld [vmem:[%s3122_s27] sm:$0x3] }
 0xe3b   :  { %2263 = vtanh.f32 %v1751_v5  ;;  %v1889_v5 = vld [vmem:[%s3056_s17 + $0x18] sm:$0xff] }
 0xe3d   :  { %v1738_v6 = vpop.f32.mrf.mxu3 }
 0xe3e   :  { %v1739_v7 = vadd.f32 %v2170_v63, %v1738_v6  ;;  %v1888_v6 = vld [vmem:[%s3056_s17 + $0x10] sm:$0xff] }
 0xe40   :  { %v1744_v8 = vmul.f32 0.044715, %v1739_v7  ;;  %v1742_v20 = vmul.f32 0.5, %v1739_v7 }
 0xe41   :  { %v2264_v11 = vpop.eup %2263 }
 0xe42   :  { %v1755_v13 = vadd.f32 1.0, %v2264_v11  ;;  %v1746_v14 = vmul.f32 %v1744_v8, %v1739_v7  ;;  %v1886_v8 = vld [vmem:[%s3056_s17] sm:$0xff]  ;;  %v1954_v11 = vld [vmem:[%s3060_s21 + $0x18] sm:$0xff] }
 0xe43   :  { %1971 = vmatpush.msra.mxu3 %v1954_v11 }
 0xe44   :  { %v1757_v16 = vmul.f32 %v1755_v13, %v1741_v12  ;;  %v1748_v17 = vmul.f32 %v1746_v14, %v1739_v7  ;;  %v1953_v12 = vld [vmem:[%s3060_s21 + $0x10] sm:$0xff]  ;;  %v1921_v14 = vld [vmem:[%s3058_s19 + $0x18] sm:$0xff] }
 0xe45   :  { %1972 = vmatpush.msra.mxu3 %v1953_v12  ;;  %1941 = vmatpush.msrb.mxu0 %v1921_v14 }
 0xe46   :  { %2101 = vmatmul.msk.f32.vlgmr.msra.gmra.mxu1 %vm912_vm2, %v1757_v16  ;;  %v1750_v18 = vadd.f32 %v1748_v17, %v1739_v7  ;;  %v1887_v7 = vld [vmem:[%s3056_s17 + $0x8] sm:$0xff]  ;;  %v1920_v17 = vld [vmem:[%s3058_s19 + $0x10] sm:$0xff] }
 0xe47   :  { %v1952_v16 = vld [vmem:[%s3060_s21 + $0x8] sm:$0xff]  ;;  %1942 = vmatpush.msrb.mxu0 %v1920_v17 }
 0xe48   :  { %v1752_v19 = vmul.f32 0.7978846, %v1750_v18  ;;  %1973 = vmatpush.msra.mxu3 %v1952_v16  ;;  %v1951_v18 = vld [vmem:[%s3060_s21] sm:$0xff] }
 0xe4a   :  { %2265 = vtanh.f32 %v1752_v19  ;;  %v1919_v19 = vld [vmem:[%s3058_s19 + $0x8] sm:$0xff]  ;;  %1974 = vmatpush.msra.mxu3 %v1951_v18 }
 0xe4b   :  { %1943 = vmatpush.msrb.mxu0 %v1919_v19 }
 0xe50   :  { %v2266_v25 = vpop.eup %2265 }
 0xe51   :  { %v1756_v21 = vadd.f32 1.0, %v2266_v25  ;;  %v1918_v25 = vld [vmem:[%s3058_s19] sm:$0xff]  ;;  %s1986_s19 = sshll.u32 %s2340_s28, 4  ;;  %s1987_s19 = int_to_ptr.vmem [resolvable:$true] %s1986_s19 }
 0xe52   :  { %1944 = vmatpush.msrb.mxu0 %v1918_v25 }
 0xe53   :  { %v1758_v22 = vmul.f32 %v1756_v21, %v1742_v20  ;;  %v2174_v20 = vld [vmem:[%s3057_s18] ss:$0 sm:$0xff] }
 0xe55   :  { %2102 = vmatmul.msk.f32.gmra.mxu1 %vm912_vm2, %v1758_v22 }
 0xec3   :  { %v1796_v23 = vpop.f32.mrf.mxu1 }
 0xec4   :  { %v1797_v24 = vadd.f32 %v2171_v35, %v1796_v23  ;;  %v2175_v23 = vld [vmem:[%s3059_s20] ss:$0 sm:$0xff] }
 0xec6   :  { %v1802_v26 = vadd.f32 %v1797_v24, %v1700_v57 }
 0xec8   :  { %v1808_v27 = vsel %vm82_vm0, %v1802_v26, 0.0 }
 0xec9   :  { %1809 = vadd.xlane.f32.xlu1 %v1808_v27  ;;  %v2176_v27 = vld [vmem:[%s3061_s22] ss:$0 sm:$0xff] }
 0xed2   :  { %v1799_v28 = vpop.f32.mrf.mxu1 }
 0xed3   :  { %v1800_v29 = vadd.f32 %v2171_v35, %v1799_v28 }
 0xed5   :  { %v1803_v30 = vadd.f32 %v1800_v29, %v1701_v51 }
 0xed7   :  { %v1811_v15 = vsel %vm82_vm0, %v1803_v30, 0.0 }
 0xed8   :  { %1812 = vadd.xlane.f32.xlu0 %v1811_v15 }
 0xf3c   :  { %v1810_v31 = vpop.xlane.xlu1 %1809 }
 0xf3d   :  { %v1814_v9 = vmul.f32 %v1810_v31, %v2475_v10 }
 0xf3f   :  { %v1816_v32 = vsub.f32 %v1802_v26, %v1814_v9 }
 0xf41   :  { %v1818_v33 = vmul.f32 %v1816_v32, %v1816_v32 }
 0xf43   :  { %v1820_v34 = vsel %vm82_vm0, %v1818_v33, 0.0 }
 0xf44   :  { %1821 = vadd.xlane.f32.xlu0 %v1820_v34 }
 0xf4b   :  { %v1813_v36 = vpop.xlane.xlu0 %1812 }
 0xf4c   :  { %v1815_v37 = vmul.f32 %v1813_v36, %v2475_v10 }
 0xf4e   :  { %v1817_v38 = vsub.f32 %v1803_v30, %v1815_v37 }
 0xf50   :  { %v1819_v39 = vmul.f32 %v1817_v38, %v1817_v38 }
 0xf52   :  { %v1823_v47 = vsel %vm82_vm0, %v1819_v39, 0.0 }
 0xf53   :  { %1824 = vadd.xlane.f32.xlu2 %v1823_v47 }
 0xfb7   :  { %v1822_v40 = vpop.xlane.xlu0 %1821 }
 0xfb8   :  { %v1826_v41 = vmul.f32 %v1822_v40, %v2475_v10 }
 0xfba   :  { %v1828_v42 = vadd.f32 1e-12, %v1826_v41 }
 0xfbc   :  { %2267 = vrsqrt.f32 %v1828_v42  ;;  %vm1836_vm2 = vweird.f32 %v1828_v42 }
 0xfc2   :  { %v2268_v52 = vpop.eup %2267 }
 0xfc3   :  { %v1831_v57 = vmul.f32 %v2268_v52, %v1828_v42  ;;  %vm1837_vm1 = vweird.f32 %v2268_v52 }
 0xfc4   :  { %vm1838_vm3 = vmor %vm1836_vm2, %vm1837_vm1 }
 0xfc5   :  { %v1832_v45 = vmul.f32 %v2268_v52, %v1831_v57 }
 0xfc6   :  { %v1825_v43 = vpop.xlane.xlu2 %1824 }
 0xfc7   :  { %v1827_v44 = vmul.f32 %v1825_v43, %v2475_v10  ;;  %v1833_v48 = vmul.f32 0.5, %v1832_v45  ;;  %v2172_v10 = vld [vmem:[%s3054_s15 + $0x1] ss:$0 sm:$0xff] }
 0xfc9   :  { %v1829_v46 = vadd.f32 1e-12, %v1827_v44  ;;  %v1834_v49 = vsub.f32 1.5, %v1833_v48 }
 0xfcb   :  { %2269 = vrsqrt.f32 %v1829_v46  ;;  %v1835_v53 = vmul.f32 %v2268_v52, %v1834_v49  ;;  %vm1846_vm5 = vweird.f32 %v1829_v46 }
 0xfcd   :  { %v1839_v58 = vsel %vm1838_vm3, %v2268_v52, %v1835_v53 }
 0xfce   :  { %v1850_v61 = vmul.f32 %v1839_v58, %v1816_v32 }
 0xfd0   :  { %v1855_v1 = vmul.f32 %v2172_v10, %v1850_v61 }
 0xfd1   :  { %v2270_v50 = vpop.eup %2269 }
 0xfd2   :  { %v1841_v51 = vmul.f32 %v2270_v50, %v1829_v46  ;;  %vm1847_vm4 = vweird.f32 %v2270_v50  ;;  %v1860_v3 = vadd.f32 %v2173_v2, %v1855_v1 }
 0xfd3   :  { %vm1848_vm6 = vmor %vm1846_vm5, %vm1847_vm4 }
 0xfd4   :  { %v1842_v54 = vmul.f32 %v2270_v50, %v1841_v51 }
 0xfd6   :  { %v1843_v56 = vmul.f32 0.5, %v1842_v54 }
 0xfd8   :  { %v1844_v59 = vsub.f32 1.5, %v1843_v56 }
 0xfda   :  { %v1845_v60 = vmul.f32 %v2270_v50, %v1844_v59 }
 0xfdc   :  { %v1849_v62 = vsel %vm1848_vm6, %v2270_v50, %v1845_v60 }
 0xfdd   :  { %v1851_v63 = vmul.f32 %v1849_v62, %v1817_v38 }
 0xfdf   :  { %v1856_v0 = vmul.f32 %v2172_v10, %v1851_v63 }
 0xfe1   :  { %v1861_v55 = vadd.f32 %v2173_v2, %v1856_v0 }
 0xfe3   :  { %1880 = vmatpush.msra.mxu2 %v1861_v55 }
 0xfe5   :  { %1881 = vmatpush.msra.mxu2 %v1860_v3 }
 0xfe6   :  { %2105 = vmatmul.msk.f32.vlgmr.msra.gmra.mxu2 %vm744_vm9, %v1862_v4  ;;  %vm1949_vm9 = vcmask 17408  }
 0xfe7   :  { %1909 = vmatpush.msrb.mxu2 %v1889_v5 }
 0xfe9   :  { %1910 = vmatpush.msrb.mxu2 %v1888_v6 }
 0xfeb   :  { %1911 = vmatpush.msrb.mxu2 %v1887_v7 }
 0xfed   :  { %1912 = vmatpush.msrb.mxu2 %v1886_v8 }
0x1069   :  { %v1883_v13 = vpop.f32.mrf.mxu2 }
0x106a   :  { %2106 = vmatmul.msk.f32.vlgmr.msrb.gmra.mxu2 %vm82_vm0, %v1883_v13 }
0x10ed   :  { %v1914_v21 = vpop.f32.mrf.mxu2 }
0x10ee   :  { %v1915_v22 = vadd.f32 %v2174_v20, %v1914_v21 }
0x10f0   :  { %2271 = vtanh.f32 %v1915_v22 }
0x10f6   :  { %v2272_v35 = vpop.eup %2271 }
0x10f7   :  { %2107 = vmatmul.msk.f32.vlgmr.msrb.gmra.mxu0 %vm82_vm0, %v2272_v35  ;;  %2108 = vmatmul.msk.f32.vlgmr.msra.gmra.mxu3 %vm82_vm0, %v2272_v35  ;;  %vm1979_vm0 = vcmask 33792  }
0x1174   :  { %v1946_v24 = vpop.f32.mrf.mxu0 }
0x1175   :  { %v1947_v26 = vadd.f32 %v2175_v23, %v1946_v24 }
0x1177   :  { %1950 = vst.msk [vmem:[#allocation2] sm:$0x3] %vm1949_vm9, %v1947_v26 }
0x1178   :  { %1991 = dma.vmem_to_hbm [thread:$0]  %s1987_s19, 32, %s1989_s3, [#allocation3]  }
0x117a   :  { %v1976_v28 = vpop.f32.mrf.mxu3 }
0x117b   :  { %v1977_v29 = vadd.f32 %v2176_v27, %v1976_v28 }
0x117d   :  { %1980 = vst.msk [vmem:[#allocation4] sm:$0x3] %vm1979_vm0, %v1977_v29 }
0x117e   :  { %2002 = dma.vmem_to_hbm [thread:$0]  %s1998_s7, 32, %s2000_s5, [#allocation5]  }
0x117f   :  { %2321 = dma.done.wait [#allocation3], 32  }
0x1180   :  { %2322 = vsyncadd [#allocation3], 4294967264 }
0x1181   :  { %2323 = dma.done.wait [#allocation5], 32  }
0x1182   :  { %2324 = vsyncadd [#allocation5], 4294967264 }
0x1183   :  { %2011 = vsyncpa [#allocation3], 1 }
0x1184   :  { %2012 = vsyncpa [#allocation5], 1 }

</bundles_post_ra>
